<compile_context>
chip_gen: v6e
topology: v6e:2x2x1
jax: 0.10.0
libtpu: 0.0.40
codegen_flags: <defaults>
</compile_context>

<pallas_src>
import functools

import jax
import jax.numpy as jnp
from jax import lax
from jax.experimental import pallas as pl
from jax.experimental.pallas import tpu as pltpu

# The module's fc layer takes 128 features = 32 channels * (H/4) * (W/4),
# so the input spatial size must be 8x8.
CIN, H, W = 4, 8, 8
C1, C2 = 64, 32
NUM_CLASSES = 1
H1, W1 = H // 2, W // 2            # after pool1: 4, 4
H2, W2 = H1 // 2, W1 // 2          # after pool2: 2, 2
FEAT = C2 * H2 * W2                # 128
K1P = 128                          # conv1 im2col K (9*CIN = 36) padded to one full lane width
CP = 128                           # conv2 per-tap channels (C1 = 64) padded to full lane width
MAX_NB = 64                        # batch-tile cap (multiple of 8); tiles stay tiny vs VMEM on all gens


def _maxpool2x2(x2d, n, h, w, c):
    """2x2 stride-2 max pool of a conv output given as [n*h*w, c] with rows in
    (n, y, x) row-major order.  Returns [n, h//2, w//2, c]; all work stays on values
    (no Ref stores); reshapes keep the lane (channel) dim untouched."""
    xw = jnp.max(x2d.reshape(n * h * (w // 2), 2, c), axis=1)        # pool along W
    return jnp.max(xw.reshape(n, h // 2, 2, w // 2, c), axis=2)      # pool along H


def cnn_kernel(p1_ref, w1_ref, b1_ref, w2_ref, b2_ref, wfc_ref, bfc_ref, out_ref, *, nb):
    # ---- conv1: im2col done in the wrapper -> ONE lane-aligned matmul + bias + relu ----
    h1 = jnp.dot(p1_ref[...], w1_ref[...],
                 preferred_element_type=jnp.float32) + b1_ref[...]
    h1 = jnp.maximum(h1, 0.0)                                        # [nb*H*W, C1]

    # ---- maxpool1 2x2/2 (vectorized, in registers) ----
    p1 = _maxpool2x2(h1, nb, H, W, C1)                               # [nb, 4, 4, C1]

    # ---- conv2 zero halo, lane/sublane aligned, built in registers ----
    # channels C1=64 -> 128 lanes (every tap below becomes a full-vreg lane chunk),
    # spatial 4x4 -> 8x8 (data at [1:5, 1:5], zeros elsewhere = the padding halo).
    p1c = jnp.concatenate(
        [p1, jnp.zeros((nb, H1, W1, CP - C1), jnp.float32)], axis=-1)        # [nb,4,4,128]
    zw_lo = jnp.zeros((nb, H1, 1, CP), jnp.float32)
    zw_hi = jnp.zeros((nb, H1, 3, CP), jnp.float32)
    p1w = jnp.concatenate([zw_lo, p1c, zw_hi], axis=2)                       # [nb,4,8,128]
    zh_lo = jnp.zeros((nb, 1, 8, CP), jnp.float32)
    zh_hi = jnp.zeros((nb, 3, 8, CP), jnp.float32)
    p1pad = jnp.concatenate([zh_lo, p1w, zh_hi], axis=1)                     # [nb,8,8,128]

    # ---- conv2: 3x3, pad=1, as ONE im2col matmul; each tap is 128 lanes so every concat
    #      boundary lands on a 128-lane multiple (K = 9*128 = 1152; w2 rows corresponding
    #      to the padded channels are zero, so the extra K contributes nothing). ----
    cols2 = [p1pad[:, ky:ky + H1, kx:kx + W1, :].reshape(nb * H1 * W1, CP)
             for ky in range(3) for kx in range(3)]
    patches2 = jnp.concatenate(cols2, axis=-1)                               # [nb*16, 1152]
    h2 = jnp.dot(patches2, w2_ref[...],
                 preferred_element_type=jnp.float32) + b2_ref[...]
    h2 = jnp.maximum(h2, 0.0)                                                # [nb*16, C2]

    # ---- maxpool2 2x2/2 + flatten in (h, w, c) order (matches the permuted fc weight) ----
    p2 = _maxpool2x2(h2, nb, H1, W1, C2)                                     # [nb, 2, 2, C2]
    feat = jnp.concatenate([p2[:, 0, 0, :], p2[:, 0, 1, :],
                            p2[:, 1, 0, :], p2[:, 1, 1, :]], axis=-1)        # [nb, FEAT]

    # ---- fc (num_classes == 1) on the VPU + sigmoid on the EUP ----
    # (a 1-column MXU matmul would light up 1/256 of the array; use jnp.dot for >1 classes)
    logits = jnp.sum(feat * wfc_ref[...], axis=-1, keepdims=True) + bfc_ref[...]
    out_ref[...] = jax.nn.sigmoid(logits)                                    # [nb, 1]


def cnn_forward(x_nchw, w1_t, b1, w2_t, b2, wfc_t, bfc):
    """x_nchw: [N, CIN, 8, 8]; torch-layout params (OIHW conv weights, [out, in] fc)."""
    n = x_nchw.shape[0]
    nb = n if n <= MAX_NB else MAX_NB            # batch tile (multiple of 8 when tiled)
    n_pad = pl.cdiv(n, nb) * nb
    n_tiles = n_pad // nb

    # ----- one-time layout prep (traced once under jit; pure data movement) -----
    # NCHW -> NHWC; conv1's padding=1 and its im2col are hoisted out of the kernel.
    # patches1 rows are (n, y, x) row-major; lanes are (ky, kx, cin), zero-padded to 128.
    x = jnp.transpose(x_nchw, (0, 2, 3, 1)).astype(jnp.float32)
    xpad = jnp.pad(x, ((0, 0), (1, 1), (1, 1), (0, 0)))
    cols1 = [xpad[:, ky:ky + H, kx:kx + W, :].reshape(n * H * W, CIN)
             for ky in range(3) for kx in range(3)]
    patches1 = jnp.concatenate(cols1, axis=-1)                           # [n*H*W, 36]
    patches1 = jnp.pad(patches1,
                       ((0, (n_pad - n) * H * W), (0, K1P - 9 * CIN)))   # [n_pad*H*W, 128]

    # conv1 weights: OIHW -> HWIO -> [36, C1]; rows zero-padded to match the lane pad.
    w1 = jnp.transpose(w1_t, (2, 3, 1, 0)).reshape(9 * CIN, C1)
    w1 = jnp.pad(w1, ((0, K1P - 9 * CIN), (0, 0)))                       # [128, C1]

    # conv2 weights: OIHW -> HWIO, in-channels zero-padded 64 -> 128 per tap, flattened to
    # [9*128, C2] in (ky, kx, cin) order so rows match the kernel's lane-aligned tap concat.
    w2 = jnp.transpose(w2_t, (2, 3, 1, 0))                               # [3,3,C1,C2]
    w2 = jnp.pad(w2, ((0, 0), (0, 0), (0, CP - C1), (0, 0)))             # [3,3,128,C2]
    w2 = w2.reshape(9 * CP, C2)                                          # [1152, C2]

    # fc weight: torch flattens (C, H, W); kernel feat is (h, w, c) -> permute once.
    wfc = jnp.transpose(wfc_t.reshape(NUM_CLASSES, C2, H2, W2),
                        (0, 2, 3, 1)).reshape(NUM_CLASSES, FEAT)         # [1, 128]

    kernel = functools.partial(cnn_kernel, nb=nb)
    out = pl.pallas_call(
        kernel,
        out_shape=jax.ShapeDtypeStruct((n_pad, NUM_CLASSES), jnp.float32),
        grid=(n_tiles,),
        in_specs=[
            pl.BlockSpec((nb * H * W, K1P), lambda i: (i, 0)),   # conv1 patches (batch-tiled)
            pl.BlockSpec((K1P, C1), lambda i: (0, 0)),           # w1  (resident)
            pl.BlockSpec((1, C1), lambda i: (0, 0)),             # b1
            pl.BlockSpec((9 * CP, C2), lambda i: (0, 0)),        # w2  (resident)
            pl.BlockSpec((1, C2), lambda i: (0, 0)),             # b2
            pl.BlockSpec((NUM_CLASSES, FEAT), lambda i: (0, 0)), # fc weight (row form)
            pl.BlockSpec((1, NUM_CLASSES), lambda i: (0, 0)),    # fc bias
        ],
        out_specs=pl.BlockSpec((nb, NUM_CLASSES), lambda i: (i, 0)),
        compiler_params=pltpu.CompilerParams(
            dimension_semantics=("parallel",)),  # batch tiles shard across v7x's 2 TensorCores
    )(patches1, w1, b1.reshape(1, C1), w2, b2.reshape(1, C2),
      wfc, bfc.reshape(1, NUM_CLASSES))
    return out[:n]


def reference(x_nchw, w1_t, b1, w2_t, b2, wfc_t, bfc):
    """Pure-JAX reference matching the PyTorch forward exactly (NCHW)."""
    dn = ('NCHW', 'OIHW', 'NCHW')
    y = lax.conv_general_dilated(x_nchw, w1_t, (1, 1), ((1, 1), (1, 1)),
                                 dimension_numbers=dn)
    y = jax.nn.relu(y + b1[None, :, None, None])
    y = lax.reduce_window(y, -jnp.inf, lax.max, (1, 1, 2, 2), (1, 1, 2, 2), 'VALID')
    y = lax.conv_general_dilated(y, w2_t, (1, 1), ((1, 1), (1, 1)),
                                 dimension_numbers=dn)
    y = jax.nn.relu(y + b2[None, :, None, None])
    y = lax.reduce_window(y, -jnp.inf, lax.max, (1, 1, 2, 2), (1, 1, 2, 2), 'VALID')
    feat = y.reshape(y.shape[0], -1)                  # torch (C, H, W) flatten
    return jax.nn.sigmoid(feat @ wfc_t.T + bfc)


if __name__ == "__main__":
    N = 2
    key = jax.random.PRNGKey(0)
    ks = jax.random.split(key, 7)
    x = jax.random.normal(ks[0], (N, CIN, H, W), jnp.float32)
    # deterministic synthetic parameters (shapes from CNN.__init__)
    w1_t = 0.1 * jax.random.normal(ks[1], (C1, CIN, 3, 3), jnp.float32)
    b1 = 0.1 * jax.random.normal(ks[2], (C1,), jnp.float32)
    w2_t = 0.1 * jax.random.normal(ks[3], (C2, C1, 3, 3), jnp.float32)
    b2 = 0.1 * jax.random.normal(ks[4], (C2,), jnp.float32)
    wfc_t = 0.1 * jax.random.normal(ks[5], (NUM_CLASSES, FEAT), jnp.float32)
    bfc = 0.1 * jax.random.normal(ks[6], (NUM_CLASSES,), jnp.float32)

    out = jax.jit(cnn_forward)(x, w1_t, b1, w2_t, b2, wfc_t, bfc)
    out = jax.block_until_ready(out)

    ref = reference(x, w1_t, b1, w2_t, b2, wfc_t, bfc)
    assert out.shape == (N, NUM_CLASSES), out.shape
    assert jnp.allclose(out, ref, atol=1e-5, rtol=1e-5), (out, ref)
    print("KERNEL_OK")
</pallas_src>

<mosaic_0001>
module attributes {stable_mosaic.version = 11 : i64} {
  func.func @cnn_kernel(%arg0: i32, %arg1: memref<128x128xf32, #tpu.memory_space<vmem>>, %arg2: memref<128x64xf32, #tpu.memory_space<vmem>>, %arg3: memref<1x64xf32, #tpu.memory_space<vmem>>, %arg4: memref<1152x32xf32, #tpu.memory_space<vmem>>, %arg5: memref<1x32xf32, #tpu.memory_space<vmem>>, %arg6: memref<1x128xf32, #tpu.memory_space<vmem>>, %arg7: memref<1x1xf32, #tpu.memory_space<vmem>>, %arg8: memref<2x1xf32, #tpu.memory_space<vmem>>) attributes {dimension_semantics = [#tpu.dimension_semantics<parallel>], iteration_bounds = array<i64: 1>, scalar_prefetch = 0 : i64, scratch_operands = 0 : i64, tpu.core_type = #tpu.core_type<tc>, window_params = [{transform_indices = @transform_0, window_bounds = array<i64: 128, 128>}, {pipeline_mode = #tpu.pipeline_mode<synchronous>, transform_indices = @transform_1, window_bounds = array<i64: 128, 64>}, {pipeline_mode = #tpu.pipeline_mode<synchronous>, transform_indices = @transform_2, window_bounds = array<i64: 1, 64>}, {pipeline_mode = #tpu.pipeline_mode<synchronous>, transform_indices = @transform_3, window_bounds = array<i64: 1152, 32>}, {pipeline_mode = #tpu.pipeline_mode<synchronous>, transform_indices = @transform_4, window_bounds = array<i64: 1, 32>}, {pipeline_mode = #tpu.pipeline_mode<synchronous>, transform_indices = @transform_5, window_bounds = array<i64: 1, 128>}, {pipeline_mode = #tpu.pipeline_mode<synchronous>, transform_indices = @transform_6, window_bounds = array<i64: 1, 1>}, {transform_indices = @transform_7, window_bounds = array<i64: 2, 1>}]} {
    %c0 = arith.constant 0 : index
    %c0_0 = arith.constant 0 : index
    %0 = vector.load %arg1[%c0, %c0_0] : memref<128x128xf32, #tpu.memory_space<vmem>>, vector<128x128xf32>
    %c0_1 = arith.constant 0 : index
    %c0_2 = arith.constant 0 : index
    %1 = vector.load %arg2[%c0_1, %c0_2] : memref<128x64xf32, #tpu.memory_space<vmem>>, vector<128x64xf32>
    %cst = arith.constant dense<0.000000e+00> : vector<128x64xf32>
    %2 = tpu.matmul %0, %1, %cst {dimension_numbers = #tpu.dot_dimension_numbers<[1], [0], [0], [1], [0, 0, 1, 1], [], []>} : vector<128x128xf32>, vector<128x64xf32>, vector<128x64xf32> -> vector<128x64xf32>
    %c0_3 = arith.constant 0 : index
    %c0_4 = arith.constant 0 : index
    %3 = vector.load %arg3[%c0_3, %c0_4] : memref<1x64xf32, #tpu.memory_space<vmem>>, vector<1x64xf32>
    %4 = vector.broadcast %3 : vector<1x64xf32> to vector<128x64xf32>
    %5 = arith.addf %2, %4 : vector<128x64xf32>
    %cst_5 = arith.constant 0.000000e+00 : f32
    %6 = vector.broadcast %cst_5 : f32 to vector<128x64xf32>
    %7 = arith.maximumf %5, %6 : vector<128x64xf32>
    %8 = vector.shape_cast %7 : vector<128x64xf32> to vector<64x2x64xf32>
    %cst_6 = arith.constant dense<0xFF800000> : vector<64x64xf32>
    %9 = vector.multi_reduction <maximumf>, %8, %cst_6 [1] : vector<64x2x64xf32> to vector<64x64xf32>
    %10 = vector.shape_cast %9 : vector<64x64xf32> to vector<2x4x2x4x64xf32>
    %cst_7 = arith.constant dense<0xFF800000> : vector<2x4x4x64xf32>
    %11 = vector.multi_reduction <maximumf>, %10, %cst_7 [2] : vector<2x4x2x4x64xf32> to vector<2x4x4x64xf32>
    %cst_8 = arith.constant 0.000000e+00 : f32
    %12 = vector.broadcast %cst_8 : f32 to vector<2x4x4x64xf32>
    %13 = tpu.concatenate %11, %12 in 3 : vector<2x4x4x64xf32>, vector<2x4x4x64xf32> -> vector<2x4x4x128xf32>
    %cst_9 = arith.constant 0.000000e+00 : f32
    %14 = vector.broadcast %cst_9 : f32 to vector<2x4x1x128xf32>
    %cst_10 = arith.constant 0.000000e+00 : f32
    %15 = vector.broadcast %cst_10 : f32 to vector<2x4x3x128xf32>
    %16 = tpu.concatenate %14, %13, %15 in 2 : vector<2x4x1x128xf32>, vector<2x4x4x128xf32>, vector<2x4x3x128xf32> -> vector<2x4x8x128xf32>
    %cst_11 = arith.constant 0.000000e+00 : f32
    %17 = vector.broadcast %cst_11 : f32 to vector<2x1x8x128xf32>
    %cst_12 = arith.constant 0.000000e+00 : f32
    %18 = vector.broadcast %cst_12 : f32 to vector<2x3x8x128xf32>
    %19 = tpu.concatenate %17, %16, %18 in 1 : vector<2x1x8x128xf32>, vector<2x4x8x128xf32>, vector<2x3x8x128xf32> -> vector<2x8x8x128xf32>
    %20 = vector.extract_strided_slice %19 {offsets = [0, 0, 0, 0], sizes = [2, 4, 4, 128], strides = [1, 1, 1, 1]} : vector<2x8x8x128xf32> to vector<2x4x4x128xf32>
    %21 = vector.shape_cast %20 : vector<2x4x4x128xf32> to vector<32x128xf32>
    %22 = vector.extract_strided_slice %19 {offsets = [0, 0, 1, 0], sizes = [2, 4, 4, 128], strides = [1, 1, 1, 1]} : vector<2x8x8x128xf32> to vector<2x4x4x128xf32>
    %23 = vector.shape_cast %22 : vector<2x4x4x128xf32> to vector<32x128xf32>
    %24 = vector.extract_strided_slice %19 {offsets = [0, 0, 2, 0], sizes = [2, 4, 4, 128], strides = [1, 1, 1, 1]} : vector<2x8x8x128xf32> to vector<2x4x4x128xf32>
    %25 = vector.shape_cast %24 : vector<2x4x4x128xf32> to vector<32x128xf32>
    %26 = vector.extract_strided_slice %19 {offsets = [0, 1, 0, 0], sizes = [2, 4, 4, 128], strides = [1, 1, 1, 1]} : vector<2x8x8x128xf32> to vector<2x4x4x128xf32>
    %27 = vector.shape_cast %26 : vector<2x4x4x128xf32> to vector<32x128xf32>
    %28 = vector.extract_strided_slice %19 {offsets = [0, 1, 1, 0], sizes = [2, 4, 4, 128], strides = [1, 1, 1, 1]} : vector<2x8x8x128xf32> to vector<2x4x4x128xf32>
    %29 = vector.shape_cast %28 : vector<2x4x4x128xf32> to vector<32x128xf32>
    %30 = vector.extract_strided_slice %19 {offsets = [0, 1, 2, 0], sizes = [2, 4, 4, 128], strides = [1, 1, 1, 1]} : vector<2x8x8x128xf32> to vector<2x4x4x128xf32>
    %31 = vector.shape_cast %30 : vector<2x4x4x128xf32> to vector<32x128xf32>
    %32 = vector.extract_strided_slice %19 {offsets = [0, 2, 0, 0], sizes = [2, 4, 4, 128], strides = [1, 1, 1, 1]} : vector<2x8x8x128xf32> to vector<2x4x4x128xf32>
    %33 = vector.shape_cast %32 : vector<2x4x4x128xf32> to vector<32x128xf32>
    %34 = vector.extract_strided_slice %19 {offsets = [0, 2, 1, 0], sizes = [2, 4, 4, 128], strides = [1, 1, 1, 1]} : vector<2x8x8x128xf32> to vector<2x4x4x128xf32>
    %35 = vector.shape_cast %34 : vector<2x4x4x128xf32> to vector<32x128xf32>
    %36 = vector.extract_strided_slice %19 {offsets = [0, 2, 2, 0], sizes = [2, 4, 4, 128], strides = [1, 1, 1, 1]} : vector<2x8x8x128xf32> to vector<2x4x4x128xf32>
    %37 = vector.shape_cast %36 : vector<2x4x4x128xf32> to vector<32x128xf32>
    %38 = tpu.concatenate %21, %23, %25, %27, %29, %31, %33, %35, %37 in 1 : vector<32x128xf32>, vector<32x128xf32>, vector<32x128xf32>, vector<32x128xf32>, vector<32x128xf32>, vector<32x128xf32>, vector<32x128xf32>, vector<32x128xf32>, vector<32x128xf32> -> vector<32x1152xf32>
    %c0_13 = arith.constant 0 : index
    %c0_14 = arith.constant 0 : index
    %39 = vector.load %arg4[%c0_13, %c0_14] : memref<1152x32xf32, #tpu.memory_space<vmem>>, vector<1152x32xf32>
    %cst_15 = arith.constant dense<0.000000e+00> : vector<32x32xf32>
    %40 = tpu.matmul %38, %39, %cst_15 {dimension_numbers = #tpu.dot_dimension_numbers<[1], [0], [0], [1], [0, 0, 1, 1], [], []>} : vector<32x1152xf32>, vector<1152x32xf32>, vector<32x32xf32> -> vector<32x32xf32>
    %c0_16 = arith.constant 0 : index
    %c0_17 = arith.constant 0 : index
    %41 = vector.load %arg5[%c0_16, %c0_17] : memref<1x32xf32, #tpu.memory_space<vmem>>, vector<1x32xf32>
    %42 = vector.broadcast %41 : vector<1x32xf32> to vector<32x32xf32>
    %43 = arith.addf %40, %42 : vector<32x32xf32>
    %cst_18 = arith.constant 0.000000e+00 : f32
    %44 = vector.broadcast %cst_18 : f32 to vector<32x32xf32>
    %45 = arith.maximumf %43, %44 : vector<32x32xf32>
    %46 = vector.shape_cast %45 : vector<32x32xf32> to vector<16x2x32xf32>
    %cst_19 = arith.constant dense<0xFF800000> : vector<16x32xf32>
    %47 = vector.multi_reduction <maximumf>, %46, %cst_19 [1] : vector<16x2x32xf32> to vector<16x32xf32>
    %48 = vector.shape_cast %47 : vector<16x32xf32> to vector<2x2x2x2x32xf32>
    %cst_20 = arith.constant dense<0xFF800000> : vector<2x2x2x32xf32>
    %49 = vector.multi_reduction <maximumf>, %48, %cst_20 [2] : vector<2x2x2x2x32xf32> to vector<2x2x2x32xf32>
    %50 = vector.extract_strided_slice %49 {offsets = [0, 0, 0, 0], sizes = [2, 1, 1, 32], strides = [1, 1, 1, 1]} : vector<2x2x2x32xf32> to vector<2x1x1x32xf32>
    %51 = vector.shape_cast %50 : vector<2x1x1x32xf32> to vector<2x32xf32>
    %52 = vector.extract_strided_slice %49 {offsets = [0, 0, 1, 0], sizes = [2, 1, 1, 32], strides = [1, 1, 1, 1]} : vector<2x2x2x32xf32> to vector<2x1x1x32xf32>
    %53 = vector.shape_cast %52 : vector<2x1x1x32xf32> to vector<2x32xf32>
    %54 = vector.extract_strided_slice %49 {offsets = [0, 1, 0, 0], sizes = [2, 1, 1, 32], strides = [1, 1, 1, 1]} : vector<2x2x2x32xf32> to vector<2x1x1x32xf32>
    %55 = vector.shape_cast %54 : vector<2x1x1x32xf32> to vector<2x32xf32>
    %56 = vector.extract_strided_slice %49 {offsets = [0, 1, 1, 0], sizes = [2, 1, 1, 32], strides = [1, 1, 1, 1]} : vector<2x2x2x32xf32> to vector<2x1x1x32xf32>
    %57 = vector.shape_cast %56 : vector<2x1x1x32xf32> to vector<2x32xf32>
    %58 = tpu.concatenate %51, %53, %55, %57 in 1 : vector<2x32xf32>, vector<2x32xf32>, vector<2x32xf32>, vector<2x32xf32> -> vector<2x128xf32>
    %c0_21 = arith.constant 0 : index
    %c0_22 = arith.constant 0 : index
    %59 = vector.load %arg6[%c0_21, %c0_22] : memref<1x128xf32, #tpu.memory_space<vmem>>, vector<1x128xf32>
    %60 = vector.broadcast %59 : vector<1x128xf32> to vector<2x128xf32>
    %61 = arith.mulf %58, %60 : vector<2x128xf32>
    %cst_23 = arith.constant dense<0.000000e+00> : vector<2xf32>
    %62 = vector.multi_reduction <add>, %61, %cst_23 [1] : vector<2x128xf32> to vector<2xf32>
    %63 = vector.shape_cast %62 : vector<2xf32> to vector<2x1xf32>
    %c0_24 = arith.constant 0 : index
    %c0_25 = arith.constant 0 : index
    %64 = vector.load %arg7[%c0_24, %c0_25] : memref<1x1xf32, #tpu.memory_space<vmem>>, vector<1x1xf32>
    %65 = vector.broadcast %64 : vector<1x1xf32> to vector<2x1xf32>
    %66 = arith.addf %63, %65 : vector<2x1xf32>
    %67 = arith.negf %66 : vector<2x1xf32>
    %68 = math.exp %67 : vector<2x1xf32>
    %cst_26 = arith.constant 1.000000e+00 : f32
    %69 = vector.broadcast %cst_26 : f32 to vector<2x1xf32>
    %70 = arith.addf %69, %68 : vector<2x1xf32>
    %71 = arith.divf %69, %70 : vector<2x1xf32>
    %c0_27 = arith.constant 0 : index
    %c0_28 = arith.constant 0 : index
    %72 = vector.load %arg8[%c0_27, %c0_28] : memref<2x1xf32, #tpu.memory_space<vmem>>, vector<2x1xf32>
    tpu.vector_store %arg8[%c0_27, %c0_28], %71 {strides = array<i32>} : memref<2x1xf32, #tpu.memory_space<vmem>>, vector<2x1xf32>,
    return
  }
  func.func @transform_0(%arg0: i32) -> (i32, i32) {
    %c0_i32 = arith.constant 0 : i32
    %c0_i32_0 = arith.constant 0 : i32
    return %arg0, %c0_i32 : i32, i32
  }
  func.func @transform_1(%arg0: i32) -> (i32, i32) {
    %c0_i32 = arith.constant 0 : i32
    %c0_i32_0 = arith.constant 0 : i32
    %c0_i32_1 = arith.constant 0 : i32
    return %c0_i32, %c0_i32_0 : i32, i32
  }
  func.func @transform_2(%arg0: i32) -> (i32, i32) {
    %c0_i32 = arith.constant 0 : i32
    %c0_i32_0 = arith.constant 0 : i32
    %c0_i32_1 = arith.constant 0 : i32
    return %c0_i32, %c0_i32_0 : i32, i32
  }
  func.func @transform_3(%arg0: i32) -> (i32, i32) {
    %c0_i32 = arith.constant 0 : i32
    %c0_i32_0 = arith.constant 0 : i32
    %c0_i32_1 = arith.constant 0 : i32
    return %c0_i32, %c0_i32_0 : i32, i32
  }
  func.func @transform_4(%arg0: i32) -> (i32, i32) {
    %c0_i32 = arith.constant 0 : i32
    %c0_i32_0 = arith.constant 0 : i32
    %c0_i32_1 = arith.constant 0 : i32
    return %c0_i32, %c0_i32_0 : i32, i32
  }
  func.func @transform_5(%arg0: i32) -> (i32, i32) {
    %c0_i32 = arith.constant 0 : i32
    %c0_i32_0 = arith.constant 0 : i32
    %c0_i32_1 = arith.constant 0 : i32
    return %c0_i32, %c0_i32_0 : i32, i32
  }
  func.func @transform_6(%arg0: i32) -> (i32, i32) {
    %c0_i32 = arith.constant 0 : i32
    %c0_i32_0 = arith.constant 0 : i32
    %c0_i32_1 = arith.constant 0 : i32
    return %c0_i32, %c0_i32_0 : i32, i32
  }
  func.func @transform_7(%arg0: i32) -> (i32, i32) {
    %c0_i32 = arith.constant 0 : i32
    %c0_i32_0 = arith.constant 0 : i32
    return %arg0, %c0_i32 : i32, i32
  }
}

</mosaic_0001>

<bundles_post_ra>
// kernel: cnn_forward.1
= control target key start
LH: loop header
LB: loop body
LE: loop exit
PB: predicated region body
PF: predicated region fallthrough
CT: control target
= control target key end

     0   :  { %v2617_v63 = vmov 1983009808   ;;  %vm580_vm0 = vcmask 517120   ;;  %vm1029_vm1 = vcmask 523264   ;;  %vm1158_vm2 = vcmask 1041409   ;;  %s2620_s29 = smov 32   ;;  %s3925_s1 = inlined_call_operand.vmem [shape: f32[128,64], index: 1, kind: input, shape index: {}]   ;;  %s3926_s0 = inlined_call_operand.vmem [shape: f32[128,128], index: 0, kind: input, shape index: {}]   ;;  %s3927_s3 = inlined_call_operand.vmem [shape: f32[1152,32], index: 3, kind: input, shape index: {}]   ;;  %s3928_s2 = inlined_call_operand.vmem [shape: f32[1,64], index: 2, kind: input, shape index: {}]   ;;  %s3929_s4 = inlined_call_operand.vmem [shape: f32[1,32], index: 4, kind: input, shape index: {}]   ;;  %s3930_s6 = inlined_call_operand.<no memory space> [shape: f32[1,1], index: 6, kind: input, shape index: {}]   ;;  %s3931_s5 = inlined_call_operand.vmem [shape: f32[1,128], index: 5, kind: input, shape index: {}]   ;;  %s3932_s7 = inlined_call_operand.vmem [shape: f32[2,1], index: 7, kind: output, shape index: {}]  }
   0x1   :  { %v59_v0 = vld [vmem:[%s3925_s1 + $0x78] sm:$0xff]  ;;  %v58_v1 = vld [vmem:[%s3925_s1 + $0x70] sm:$0xff]  ;;  %v57_v2 = vld [vmem:[%s3925_s1 + $0x68] sm:$0xff]  ;;  %vm1160_vm3 = vcmask 1042434   ;;  %vm1162_vm4 = vcmask 1043459   ;;  %vm1225_vm5 = vcmask 1040384  }
   0x2   :  { %2513 = vmatprep.subr.mxu0 %v59_v0  ;;  %v56_v3 = vld [vmem:[%s3925_s1 + $0x60] sm:$0xff]  ;;  %v55_v5 = vld [vmem:[%s3925_s1 + $0x58] sm:$0xff]  ;;  %v54_v6 = vld [vmem:[%s3925_s1 + $0x50] sm:$0xff]  ;;  %vm1234_vm6 = vcmask 1044480   ;;  %vm1257_vm7 = vcmask 1042432   ;;  %vm1258_vm8 = vcmask 1046532  }
   0x3   :  { %2514 = vmatpush3.msra.mxu0 %v59_v0  ;;  %v28_v4 = vld [vmem:[%s3926_s0] sm:$0xff]  ;;  %v53_v7 = vld [vmem:[%s3925_s1 + $0x48] sm:$0xff]  ;;  %v51_v9 = vld [vmem:[%s3925_s1 + $0x38] sm:$0xff]  ;;  %v246_v0 = vunpack.c.l.s4 %v2617_v63  ;;  %vm1288_vm10 = vcmask 1041408   ;;  %vm1289_vm11 = vcmask 1045508   ;;  %vm2067_vm13 = vcmask 254976  }
   0x4   :  { %2515 = vmatprep.subr.mxu0 %v58_v1  ;;  %2545 = vmatprep.mubr.f32.mxu0 %v28_v4  ;;  %v52_v8 = vld [vmem:[%s3925_s1 + $0x40] sm:$0xff]  ;;  %v50_v10 = vld [vmem:[%s3925_s1 + $0x30] sm:$0xff]  ;;  %v49_v11 = vld [vmem:[%s3925_s1 + $0x28] sm:$0xff]  ;;  %vm2180_vm14 = vcmask 261120   ;;  %s2621_s30 = smov 64   ;;  %vm2229_vm15 = vcmask 785408  }
   0x5   :  { %2516 = vmatpush3.msra.mxu0 %v58_v1  ;;  %v48_v12 = vld [vmem:[%s3925_s1 + $0x20] sm:$0xff]  ;;  %v47_v13 = vld [vmem:[%s3925_s1 + $0x18] sm:$0xff]  ;;  %v46_v14 = vld [vmem:[%s3925_s1 + $0x10] sm:$0xff]  ;;  %v248_v1 = vlaneseq  ;;  %v247_v4 = vunpack.c.0.s8 %v246_v0 }
   0x6   :  { %2517 = vmatprep.subr.mxu0 %v57_v2  ;;  %v45_v15 = vld [vmem:[%s3925_s1 + $0x8] sm:$0xff]  ;;  %v44_v16 = vld [vmem:[%s3925_s1] sm:$0xff]  ;;  %v30_v18 = vld [vmem:[%s3926_s0 + $0x10] sm:$0xff] }
   0x7   :  { %2518 = vmatpush3.msra.mxu0 %v57_v2  ;;  %v29_v17 = vld [vmem:[%s3926_s0 + $0x8] sm:$0xff]  ;;  %v31_v19 = vld [vmem:[%s3926_s0 + $0x18] sm:$0xff]  ;;  %v32_v20 = vld [vmem:[%s3926_s0 + $0x20] sm:$0xff] }
   0x8   :  { %2519 = vmatprep.subr.mxu0 %v56_v3  ;;  %v33_v21 = vld [vmem:[%s3926_s0 + $0x28] sm:$0xff]  ;;  %v34_v22 = vld [vmem:[%s3926_s0 + $0x30] sm:$0xff]  ;;  %v35_v23 = vld [vmem:[%s3926_s0 + $0x38] sm:$0xff] }
   0x9   :  { %2520 = vmatpush3.msra.mxu0 %v56_v3  ;;  %v36_v24 = vld [vmem:[%s3926_s0 + $0x40] sm:$0xff]  ;;  %v37_v25 = vld [vmem:[%s3926_s0 + $0x48] sm:$0xff]  ;;  %v38_v26 = vld [vmem:[%s3926_s0 + $0x50] sm:$0xff] }
   0xa   :  { %2521 = vmatprep.subr.mxu0 %v55_v5  ;;  %v39_v27 = vld [vmem:[%s3926_s0 + $0x58] sm:$0xff]  ;;  %v40_v28 = vld [vmem:[%s3926_s0 + $0x60] sm:$0xff]  ;;  %v41_v29 = vld [vmem:[%s3926_s0 + $0x68] sm:$0xff] }
   0xb   :  { %2522 = vmatpush3.msra.mxu0 %v55_v5  ;;  %v42_v30 = vld [vmem:[%s3926_s0 + $0x70] sm:$0xff]  ;;  %v43_v31 = vld [vmem:[%s3926_s0 + $0x78] sm:$0xff]  ;;  %v1460_v40 = vld [vmem:[%s3927_s3 + $0x1e8] sm:$0xff]  ;;  %v249_v5 = vshrl.u32 %v248_v1, 7 }
   0xc   :  { %2523 = vmatprep.subr.mxu0 %v54_v6  ;;  %v1462_v32 = vld [vmem:[%s3927_s3 + $0x1f8] sm:$0xff]  ;;  %v1461_v36 = vld [vmem:[%s3927_s3 + $0x1f0] sm:$0xff]  ;;  %v1428_v41 = vld [vmem:[%s3927_s3 + $0xe8] sm:$0xff] }
   0xd   :  { %2524 = vmatpush3.msra.mxu0 %v54_v6  ;;  %v1430_v33 = vld [vmem:[%s3927_s3 + $0xf8] sm:$0xff]  ;;  %v1429_v37 = vld [vmem:[%s3927_s3 + $0xf0] sm:$0xff]  ;;  %v1444_v42 = vld [vmem:[%s3927_s3 + $0x168] sm:$0xff] }
   0xe   :  { %2525 = vmatprep.subr.mxu0 %v53_v7  ;;  %v1446_v34 = vld [vmem:[%s3927_s3 + $0x178] sm:$0xff]  ;;  %2317 = vmatprep.subr.mxu1 %v1430_v33  ;;  %v1445_v38 = vld [vmem:[%s3927_s3 + $0x170] sm:$0xff]  ;;  %v1412_v43 = vld [vmem:[%s3927_s3 + $0x68] sm:$0xff] }
   0xf   :  { %2526 = vmatpush3.msra.mxu0 %v53_v7  ;;  %v1414_v35 = vld [vmem:[%s3927_s3 + $0x78] sm:$0xff]  ;;  %v1413_v39 = vld [vmem:[%s3927_s3 + $0x70] sm:$0xff]  ;;  %v1459_v44 = vld [vmem:[%s3927_s3 + $0x1e0] sm:$0xff] }
  0x10   :  { %2527 = vmatprep.subr.mxu0 %v52_v8  ;;  %2318 = vmatpush3.msra.mxu1 %v1414_v35  ;;  %v1427_v45 = vld [vmem:[%s3927_s3 + $0xe0] sm:$0xff]  ;;  %v1458_v48 = vld [vmem:[%s3927_s3 + $0x1d8] sm:$0xff]  ;;  %v1457_v52 = vld [vmem:[%s3927_s3 + $0x1d0] sm:$0xff] }
  0x11   :  { %2528 = vmatpush3.msra.mxu0 %v52_v8  ;;  %2319 = vmatprep.subr.mxu1 %v1429_v37  ;;  %v1443_v46 = vld [vmem:[%s3927_s3 + $0x160] sm:$0xff]  ;;  %v1426_v49 = vld [vmem:[%s3927_s3 + $0xd8] sm:$0xff]  ;;  %v1425_v53 = vld [vmem:[%s3927_s3 + $0xd0] sm:$0xff] }
  0x12   :  { %2529 = vmatprep.subr.mxu0 %v51_v9  ;;  %2320 = vmatpush3.msra.mxu1 %v1413_v39  ;;  %v1411_v47 = vld [vmem:[%s3927_s3 + $0x60] sm:$0xff]  ;;  %v1442_v50 = vld [vmem:[%s3927_s3 + $0x158] sm:$0xff]  ;;  %v1441_v54 = vld [vmem:[%s3927_s3 + $0x150] sm:$0xff] }
  0x13   :  { %2530 = vmatpush3.msra.mxu0 %v51_v9  ;;  %2321 = vmatprep.subr.mxu1 %v1428_v41  ;;  %v1410_v51 = vld [vmem:[%s3927_s3 + $0x58] sm:$0xff]  ;;  %v1409_v55 = vld [vmem:[%s3927_s3 + $0x50] sm:$0xff]  ;;  %v1456_v56 = vld [vmem:[%s3927_s3 + $0x1c8] sm:$0xff]  ;;  %v2863_v9 = vsub.s32 %v247_v4, %v249_v5 }
  0x14   :  { %2531 = vmatprep.subr.mxu0 %v50_v10  ;;  %2322 = vmatpush3.msra.mxu1 %v1412_v43  ;;  %v1424_v57 = vld [vmem:[%s3927_s3 + $0xc8] sm:$0xff]  ;;  %v1455_v60 = vld [vmem:[%s3927_s3 + $0x1c0] sm:$0xff]  ;;  %v1454_v3 = vld [vmem:[%s3927_s3 + $0x1b8] sm:$0xff] }
  0x15   :  { %2532 = vmatpush3.msra.mxu0 %v50_v10  ;;  %2323 = vmatprep.subr.mxu1 %v1427_v45  ;;  %v1440_v58 = vld [vmem:[%s3927_s3 + $0x148] sm:$0xff]  ;;  %v1423_v61 = vld [vmem:[%s3927_s3 + $0xc0] sm:$0xff]  ;;  %v1437_v37 = vld [vmem:[%s3927_s3 + $0x130] sm:$0xff] }
  0x16   :  { %2533 = vmatprep.subr.mxu0 %v49_v11  ;;  %2324 = vmatpush3.msra.mxu1 %v1411_v47  ;;  %v1408_v59 = vld [vmem:[%s3927_s3 + $0x48] sm:$0xff]  ;;  %v1439_v62 = vld [vmem:[%s3927_s3 + $0x140] sm:$0xff]  ;;  %vm3338_vm9 = vmor %vm1257_vm7, %vm1258_vm8 }
  0x17   :  { %2534 = vmatpush3.msra.mxu0 %v49_v11  ;;  %2325 = vmatprep.subr.mxu1 %v1426_v49  ;;  %v1407_v2 = vld [vmem:[%s3927_s3 + $0x40] sm:$0xff]  ;;  %v1452_v43 = vld [vmem:[%s3927_s3 + $0x1a8] sm:$0xff]  ;;  %vm3364_vm12 = vmor %vm1288_vm10, %vm1289_vm11 }
  0x18   :  { %2535 = vmatprep.subr.mxu0 %v48_v12  ;;  %2326 = vmatpush3.msra.mxu1 %v1410_v51  ;;  %v2860_v6 = vld [vmem:[%s3928_s2] ss:$0 sm:$0xff] }
  0x19   :  { %2536 = vmatpush3.msra.mxu0 %v48_v12  ;;  %2327 = vmatprep.subr.mxu1 %v1425_v53 }
  0x1a   :  { %2537 = vmatprep.subr.mxu0 %v47_v13  ;;  %2328 = vmatpush3.msra.mxu1 %v1409_v55 }
  0x1b   :  { %2538 = vmatpush3.msra.mxu0 %v47_v13  ;;  %2329 = vmatprep.subr.mxu1 %v1424_v57  ;;  %v1422_v13 = vld [vmem:[%s3927_s3 + $0xb8] sm:$0xff] }
  0x1c   :  { %2539 = vmatprep.subr.mxu0 %v46_v14  ;;  %2330 = vmatpush3.msra.mxu1 %v1408_v59 }
  0x1d   :  { %2540 = vmatpush3.msra.mxu0 %v46_v14  ;;  %2331 = vmatprep.subr.mxu1 %v1423_v61  ;;  %v1438_v14 = vld [vmem:[%s3927_s3 + $0x138] sm:$0xff] }
  0x1e   :  { %2541 = vmatprep.subr.mxu0 %v45_v15  ;;  %2332 = vmatpush3.msra.mxu1 %v1407_v2 }
  0x1f   :  { %2542 = vmatpush3.msra.mxu0 %v45_v15  ;;  %2333 = vmatprep.subr.mxu1 %v1422_v13  ;;  %v1406_v15 = vld [vmem:[%s3927_s3 + $0x38] sm:$0xff] }
  0x20   :  { %2543 = vmatprep.subr.mxu0 %v44_v16  ;;  %2334 = vmatpush3.msra.mxu1 %v1406_v15 }
  0x21   :  { %2544 = vmatpush3.msra.mxu0 %v44_v16  ;;  %v1453_v16 = vld [vmem:[%s3927_s3 + $0x1b0] sm:$0xff] }
  0x22   :  { %2546 = vmatmul.mubr.f32.vlgmr.msra.gmra.mxu0 %v29_v17  ;;  %2361 = vmatprep.subr.mxu0 %v1462_v32 }
  0x23   :  { %2548 = vmatprep.mubr.f32.mxu0 %v30_v18  ;;  %2362 = vmatpush3.msra.mxu0 %v1446_v34 }
  0x24   :  { %2363 = vmatprep.subr.mxu0 %v1461_v36  ;;  %v1421_v36 = vld [vmem:[%s3927_s3 + $0xb0] sm:$0xff] }
  0x25   :  { %2364 = vmatpush3.msra.mxu0 %v1445_v38  ;;  %2335 = vmatprep.subr.mxu1 %v1421_v36 }
  0x26   :  { %2549 = vmatmul.mubr.f32.gmra.mxu0 %v31_v19  ;;  %2365 = vmatprep.subr.mxu0 %v1460_v40 }
  0x27   :  { %2551 = vmatprep.mubr.f32.mxu0 %v32_v20  ;;  %2366 = vmatpush3.msra.mxu0 %v1444_v42  ;;  %v1405_v42 = vld [vmem:[%s3927_s3 + $0x30] sm:$0xff] }
  0x28   :  { %2367 = vmatprep.subr.mxu0 %v1459_v44  ;;  %2336 = vmatpush3.msra.mxu1 %v1405_v42 }
  0x29   :  { %2368 = vmatpush3.msra.mxu0 %v1443_v46 }
  0x2a   :  { %2552 = vmatmul.mubr.f32.gmra.mxu0 %v33_v21  ;;  %2369 = vmatprep.subr.mxu0 %v1458_v48 }
  0x2b   :  { %2554 = vmatprep.mubr.f32.mxu0 %v34_v22  ;;  %2370 = vmatpush3.msra.mxu0 %v1442_v50 }
  0x2c   :  { %2371 = vmatprep.subr.mxu0 %v1457_v52 }
  0x2d   :  { %2372 = vmatpush3.msra.mxu0 %v1441_v54 }
  0x2e   :  { %2555 = vmatmul.mubr.f32.gmra.mxu0 %v35_v23  ;;  %2373 = vmatprep.subr.mxu0 %v1456_v56 }
  0x2f   :  { %2557 = vmatprep.mubr.f32.mxu0 %v36_v24  ;;  %2374 = vmatpush3.msra.mxu0 %v1440_v58 }
  0x30   :  { %2375 = vmatprep.subr.mxu0 %v1455_v60 }
  0x31   :  { %2376 = vmatpush3.msra.mxu0 %v1439_v62 }
  0x32   :  { %2558 = vmatmul.mubr.f32.gmra.mxu0 %v37_v25  ;;  %2377 = vmatprep.subr.mxu0 %v1454_v3 }
  0x33   :  { %2560 = vmatprep.mubr.f32.mxu0 %v38_v26  ;;  %2378 = vmatpush3.msra.mxu0 %v1438_v14 }
  0x34   :  { %2379 = vmatprep.subr.mxu0 %v1453_v16 }
  0x35   :  { %2380 = vmatpush3.msra.mxu0 %v1437_v37 }
  0x36   :  { %2561 = vmatmul.mubr.f32.gmra.mxu0 %v39_v27  ;;  %2381 = vmatprep.subr.mxu0 %v1452_v43 }
  0x37   :  { %2563 = vmatprep.mubr.f32.mxu0 %v40_v28 }
  0x3a   :  { %2564 = vmatmul.mubr.f32.gmra.mxu0 %v41_v29 }
  0x3b   :  { %2566 = vmatprep.mubr.f32.mxu0 %v42_v30 }
  0x3e   :  { %2567 = vmatmul.mubr.f32.gmra.mxu0 %v43_v31 }
  0xe2   :  { %v2547_v7 = vpop.f32.mrf.mxu0 }
  0xe3   :  { %v139_v8 = vadd.f32 %v2547_v7, %v2860_v6 }
  0xe4   :  { %v133_v10 = vpop.f32.mrf.mxu0 }
  0xe5   :  { %v213_v11 = vmax.f32 %v139_v8, 0.0  ;;  %v134_v12 = vadd.f32 %v2860_v6, %v133_v10 }
  0xe6   :  { %v2550_v20 = vpop.f32.mrf.mxu0 }
  0xe7   :  { %v261_v17 = vcombine.high %v213_v11, %v213_v11  ;;  %v268_v18 = vrot.slane %v213_v11, %v2863_v9  ;;  %v212_v19 = vmax.f32 %v134_v12, 0.0  ;;  %v149_v27 = vadd.f32 %v2550_v20, %v2860_v6 }
  0xe8   :  { %v143_v4 = vpop.f32.mrf.mxu0 }
  0xe9   :  { %v275_v21 = vrot.slane %v261_v17, %v2863_v9  ;;  %v276_v22 = vcombine.high %v268_v18, %v268_v18  ;;  %v609_v23 = vsel %vm580_vm0, %v268_v18, -inf  ;;  %v244_v24 = vcombine.high %v212_v19, %v212_v19 }
  0xea   :  { %v610_v25 = vrot.slane %v609_v23, 4  ;;  %v251_v26 = vrot.slane %v212_v19, %v2863_v9  ;;  %v215_v10 = vmax.f32 %v149_v27, 0.0  ;;  %v144_v17 = vadd.f32 %v2860_v6, %v143_v4 }
  0xeb   :  { %v277_v28 = vcombine.high %v275_v21, %v275_v21  ;;  %v616_v29 = vsel %vm580_vm0, %v276_v22, -inf  ;;  %v623_v30 = vsel %vm580_vm0, %v275_v21, -inf  ;;  %v258_v31 = vrot.slane %v244_v24, %v2863_v9 }
  0xec   :  { %v611_v32 = vmax.f32 %v609_v23, %v610_v25  ;;  %v617_v33 = vrot.slane %v616_v29, 4  ;;  %v624_v34 = vrot.slane %v623_v30, 4  ;;  %v259_v35 = vcombine.high %v251_v26, %v251_v26 }
  0xed   :  { %v630_v38 = vsel %vm580_vm0, %v277_v28, -inf  ;;  %v260_v39 = vcombine.high %v258_v31, %v258_v31  ;;  %v581_v40 = vsel %vm580_vm0, %v251_v26, -inf  ;;  %v595_v41 = vsel %vm580_vm0, %v258_v31, -inf }
  0xee   :  { %v612_v44 = vrot.slane %v611_v32, 2  ;;  %v618_v45 = vmax.f32 %v616_v29, %v617_v33  ;;  %v625_v46 = vmax.f32 %v623_v30, %v624_v34  ;;  %v631_v47 = vrot.slane %v630_v38, 4  ;;  %v1420_v34 = vld [vmem:[%s3927_s3 + $0xa8] sm:$0xff] }
  0xef   :  { %v582_v48 = vrot.slane %v581_v40, 4  ;;  %v588_v49 = vsel %vm580_vm0, %v259_v35, -inf  ;;  %v596_v50 = vrot.slane %v595_v41, 4  ;;  %v602_v51 = vsel %vm580_vm0, %v260_v39, -inf  ;;  %v1436_v35 = vld [vmem:[%s3927_s3 + $0x128] sm:$0xff]  ;;  %2337 = vmatprep.subr.mxu1 %v1420_v34  ;;  %v2553_v34 = vpop.f32.mrf.mxu0 }
  0xf0   :  { %v613_v52 = vmax.f32 %v611_v32, %v612_v44  ;;  %v619_v53 = vrot.slane %v618_v45, 2  ;;  %v626_v54 = vrot.slane %v625_v46, 2  ;;  %v632_v55 = vmax.f32 %v630_v38, %v631_v47  ;;  %2382 = vmatpush3.msra.mxu0 %v1436_v35  ;;  %v1435_v47 = vld [vmem:[%s3927_s3 + $0x120] sm:$0xff] }
  0xf1   :  { %v583_v56 = vmax.f32 %v581_v40, %v582_v48  ;;  %v589_v57 = vrot.slane %v588_v49, 4  ;;  %v597_v58 = vmax.f32 %v595_v41, %v596_v50  ;;  %v603_v59 = vrot.slane %v602_v51, 4  ;;  %v1404_v40 = vld [vmem:[%s3927_s3 + $0x28] sm:$0xff]  ;;  %v1451_v41 = vld [vmem:[%s3927_s3 + $0x1a0] sm:$0xff] }
  0xf2   :  { %v614_v60 = vrot.slane %v613_v52, 1  ;;  %v620_v61 = vmax.f32 %v618_v45, %v619_v53  ;;  %v627_v62 = vmax.f32 %v625_v46, %v626_v54  ;;  %v633_v63 = vrot.slane %v632_v55, 2  ;;  %2338 = vmatpush3.msra.mxu1 %v1404_v40  ;;  %v1419_v46 = vld [vmem:[%s3927_s3 + $0xa0] sm:$0xff]  ;;  %2383 = vmatprep.subr.mxu0 %v1451_v41  ;;  %v1450_v53 = vld [vmem:[%s3927_s3 + $0x198] sm:$0xff] }
  0xf3   :  { %v584_v0 = vrot.slane %v583_v56, 2  ;;  %v590_v1 = vmax.f32 %v588_v49, %v589_v57  ;;  %v598_v2 = vrot.slane %v597_v58, 2  ;;  %v604_v3 = vmax.f32 %v602_v51, %v603_v59  ;;  %2339 = vmatprep.subr.mxu1 %v1419_v46  ;;  %2384 = vmatpush3.msra.mxu0 %v1435_v47  ;;  %v1434_v59 = vld [vmem:[%s3927_s3 + $0x118] sm:$0xff]  ;;  %v1415_v35 = vld [vmem:[%s3927_s3 + $0x80] sm:$0xff] }
  0xf4   :  { %v621_v5 = vrot.slane %v620_v61, 1  ;;  %v628_v7 = vrot.slane %v627_v62, 1  ;;  %v634_v8 = vmax.f32 %v632_v55, %v633_v63  ;;  %v615_v15 = vmax.f32 %v613_v52, %v614_v60  ;;  %v1403_v52 = vld [vmem:[%s3927_s3 + $0x20] sm:$0xff]  ;;  %2385 = vmatprep.subr.mxu0 %v1450_v53 }
  0xf5   :  { %v585_v11 = vmax.f32 %v583_v56, %v584_v0  ;;  %v591_v12 = vrot.slane %v590_v1, 2  ;;  %v599_v13 = vmax.f32 %v597_v58, %v598_v2  ;;  %v605_v14 = vrot.slane %v604_v3, 2  ;;  %2340 = vmatpush3.msra.mxu1 %v1403_v52  ;;  %v1418_v58 = vld [vmem:[%s3927_s3 + $0x98] sm:$0xff]  ;;  %2386 = vmatpush3.msra.mxu0 %v1434_v59 }
  0xf6   :  { %v635_v16 = vrot.slane %v634_v8, 1  ;;  %v622_v18 = vmax.f32 %v620_v61, %v621_v5  ;;  %v629_v22 = vmax.f32 %v627_v62, %v628_v7  ;;  %v295_v24 = vcombine.high %v215_v10, %v215_v10  ;;  %2341 = vmatprep.subr.mxu1 %v1418_v58  ;;  %v1402_v0 = vld [vmem:[%s3927_s3 + $0x18] sm:$0xff]  ;;  %v1417_v7 = vld [vmem:[%s3927_s3 + $0x90] sm:$0xff]  ;;  %v153_v58 = vpop.f32.mrf.mxu0 }
  0xf7   :  { %v586_v19 = vrot.slane %v585_v11, 1  ;;  %v592_v20 = vmax.f32 %v590_v1, %v591_v12  ;;  %v606_v21 = vmax.f32 %v604_v3, %v605_v14  ;;  %v600_v23 = vrot.slane %v599_v13, 1  ;;  %v1449_v1 = vld [vmem:[%s3927_s3 + $0x190] sm:$0xff]  ;;  %2342 = vmatpush3.msra.mxu1 %v1402_v0 }
  0xf8   :  { %v636_v25 = vmax.f32 %v634_v8, %v635_v16  ;;  %v302_v29 = vrot.slane %v215_v10, %v2863_v9  ;;  %v309_v30 = vrot.slane %v295_v24, %v2863_v9  ;;  %v2907_v31 = vsel %vm1029_vm1, %v615_v15, -inf  ;;  %v1433_v8 = vld [vmem:[%s3927_s3 + $0x110] sm:$0xff]  ;;  %2387 = vmatprep.subr.mxu0 %v1449_v1  ;;  %v1448_v15 = vld [vmem:[%s3927_s3 + $0x188] sm:$0xff]  ;;  %2343 = vmatprep.subr.mxu1 %v1417_v7 }
  0xf9   :  { %v593_v26 = vrot.slane %v592_v20, 1  ;;  %v587_v28 = vmax.f32 %v585_v11, %v586_v19  ;;  %v607_v27 = vrot.slane %v606_v21, 1  ;;  %v2910_v32 = vsel %vm1029_vm1, %v622_v18, -inf  ;;  %v1401_v14 = vld [vmem:[%s3927_s3 + $0x10] sm:$0xff]  ;;  %2388 = vmatpush3.msra.mxu0 %v1433_v8 }
  0xfa   :  { %v214_v33 = vmax.f32 %v144_v17, 0.0  ;;  %v2919_v36 = vsel %vm1029_vm1, %v629_v22, -inf  ;;  %v601_v37 = vmax.f32 %v599_v13, %v600_v23  ;;  %v310_v38 = vcombine.high %v302_v29, %v302_v29  ;;  %2344 = vmatpush3.msra.mxu1 %v1401_v14  ;;  %2389 = vmatprep.subr.mxu0 %v1448_v15 }
  0xfb   :  { %v311_v39 = vcombine.high %v309_v30, %v309_v30  ;;  %v2928_v42 = vsel %vm1029_vm1, %v636_v25, -inf  ;;  %v2930_v43 = vmax.f32 %v592_v20, %v593_v26  ;;  %v665_v44 = vsel %vm580_vm0, %v302_v29, -inf  ;;  %v1416_v20 = vld [vmem:[%s3927_s3 + $0x88] sm:$0xff] }
  0xfc   :  { %v679_v45 = vsel %vm580_vm0, %v309_v30, -inf  ;;  %v2940_v48 = vmax.f32 %v606_v21, %v607_v27  ;;  %v2943_v49 = vsel %vm1029_vm1, %v587_v28, -inf  ;;  %v666_v50 = vrot.slane %v665_v44, 4  ;;  %v1432_v21 = vld [vmem:[%s3927_s3 + $0x108] sm:$0xff]  ;;  %v1447_v28 = vld [vmem:[%s3927_s3 + $0x180] sm:$0xff]  ;;  %2345 = vmatprep.subr.mxu1 %v1416_v20 }
  0xfd   :  { %v672_v51 = vsel %vm580_vm0, %v310_v38, -inf  ;;  %v680_v55 = vrot.slane %v679_v45, 4  ;;  %v686_v56 = vsel %vm580_vm0, %v311_v39, -inf  ;;  %v278_v57 = vcombine.high %v214_v33, %v214_v33  ;;  %v1400_v26 = vld [vmem:[%s3927_s3 + $0x8] sm:$0xff]  ;;  %2390 = vmatpush3.msra.mxu0 %v1432_v21 }
  0xfe   :  { %v673_v54 = vrot.slane %v672_v51, 4  ;;  %v2960_v60 = vsel %vm1029_vm1, %v601_v37, -inf  ;;  %v667_v61 = vmax.f32 %v665_v44, %v666_v50  ;;  %v687_v62 = vrot.slane %v686_v56, 4  ;;  %v1431_v37 = vld [vmem:[%s3927_s3 + $0x100] sm:$0xff]  ;;  %2346 = vmatpush3.msra.mxu1 %v1400_v26  ;;  %2391 = vmatprep.subr.mxu0 %v1447_v28 }
  0xff   :  { %v285_v63 = vrot.slane %v214_v33, %v2863_v9  ;;  %v1032_v2 = vmax.f32 %v2943_v49, %v2907_v31  ;;  %v681_v4 = vmax.f32 %v679_v45, %v680_v55  ;;  %v292_v5 = vrot.slane %v278_v57, %v2863_v9  ;;  %v1399_v44 = vld [vmem:[%s3927_s3] sm:$0xff]  ;;  %2347 = vmatprep.subr.mxu1 %v1415_v35 }
 0x100   :  { %v674_v3 = vmax.f32 %v672_v51, %v673_v54  ;;  %v668_v10 = vrot.slane %v667_v61, 2  ;;  %v688_v11 = vmax.f32 %v686_v56, %v687_v62  ;;  %v1033_v38 = vsel %vm1029_vm1, %v2930_v43, -inf  ;;  %2392 = vmatpush3.msra.mxu0 %v1431_v37  ;;  %2348 = vmatpush3.msra.mxu1 %v1399_v44 }
 0x101   :  { %v293_v12 = vcombine.high %v285_v63, %v285_v63  ;;  %v637_v13 = vsel %vm580_vm0, %v285_v63, -inf  ;;  %v682_v17 = vrot.slane %v681_v4, 2  ;;  %v294_v18 = vcombine.high %v292_v5, %v292_v5 }
 0x102   :  { %v675_v16 = vrot.slane %v674_v3, 2  ;;  %v638_v19 = vrot.slane %v637_v13, 4  ;;  %v669_v22 = vmax.f32 %v667_v61, %v668_v10  ;;  %v689_v23 = vrot.slane %v688_v11, 2 }
 0x103   :  { %v644_v24 = vsel %vm580_vm0, %v293_v12, -inf  ;;  %v651_v25 = vsel %vm580_vm0, %v292_v5, -inf  ;;  %v683_v29 = vmax.f32 %v681_v4, %v682_v17  ;;  %v658_v41 = vsel %vm580_vm0, %v294_v18, -inf }
 0x104   :  { %v676_v27 = vmax.f32 %v674_v3, %v675_v16  ;;  %v639_v30 = vmax.f32 %v637_v13, %v638_v19  ;;  %v645_v33 = vrot.slane %v644_v24, 4  ;;  %v690_v39 = vmax.f32 %v688_v11, %v689_v23  ;;  %v2556_v13 = vpop.f32.mrf.mxu0 }
 0x105   :  { %v652_v40 = vrot.slane %v651_v25, 4  ;;  %v3013_v45 = vsel %vm1029_vm1, %v2940_v48, -inf  ;;  %v670_v46 = vrot.slane %v669_v22, 1  ;;  %v659_v52 = vrot.slane %v658_v41, 4 }
 0x106   :  { %v640_v47 = vrot.slane %v639_v30, 2  ;;  %v646_v50 = vmax.f32 %v644_v24, %v645_v33  ;;  %v677_v43 = vrot.slane %v676_v27, 1  ;;  %v159_v53 = vadd.f32 %v2553_v34, %v2860_v6 }
 0x107   :  { %v653_v51 = vmax.f32 %v651_v25, %v652_v40  ;;  %v684_v54 = vrot.slane %v683_v29, 1  ;;  %v691_v55 = vrot.slane %v690_v39, 1  ;;  %v1035_v59 = vmax.f32 %v1033_v38, %v2910_v32  ;;  %v1526_v38 = vld [vmem:[%s3927_s3 + $0x3f8] sm:$0xff] }
 0x108   :  { %v641_v56 = vmax.f32 %v639_v30, %v640_v47  ;;  %v647_v57 = vrot.slane %v646_v50, 2  ;;  %v660_v62 = vmax.f32 %v658_v41, %v659_v52  ;;  %v671_v0 = vmax.f32 %v669_v22, %v670_v46  ;;  %2449 = vmatprep.subr.mxu0 %v1526_v38 }
 0x109   :  { %v654_v61 = vrot.slane %v653_v51, 2  ;;  %v678_v4 = vmax.f32 %v676_v27, %v677_v43  ;;  %v217_v8 = vmax.f32 %v159_v53, 0.0  ;;  %v685_v10 = vmax.f32 %v683_v29, %v684_v54 }
 0x10a   :  { %v642_v1 = vrot.slane %v641_v56, 1  ;;  %v648_v3 = vmax.f32 %v646_v50, %v647_v57  ;;  %v661_v7 = vrot.slane %v660_v62, 2  ;;  %v692_v11 = vmax.f32 %v690_v39, %v691_v55 }
 0x10b   :  { %v655_v5 = vmax.f32 %v653_v51, %v654_v61  ;;  %v154_v32 = vadd.f32 %v2860_v6, %v153_v58  ;;  %v329_v16 = vcombine.high %v217_v8, %v217_v8  ;;  %v336_v17 = vrot.slane %v217_v8, %v2863_v9 }
 0x10c   :  { %v649_v12 = vrot.slane %v648_v3, 1  ;;  %v643_v14 = vmax.f32 %v641_v56, %v642_v1  ;;  %v662_v15 = vmax.f32 %v660_v62, %v661_v7  ;;  %v3027_v18 = vsel %vm1158_vm2, %v1035_v59, %v1032_v2 }
 0x10d   :  { %v3030_v19 = vsel %vm1029_vm1, %v671_v0, -inf  ;;  %v656_v20 = vrot.slane %v655_v5, 1  ;;  %v216_v21 = vmax.f32 %v154_v32, 0.0  ;;  %v3033_v22 = vsel %vm1029_vm1, %v678_v4, -inf }
 0x10e   :  { %v650_v23 = vmax.f32 %v648_v3, %v649_v12  ;;  %v343_v24 = vrot.slane %v329_v16, %v2863_v9  ;;  %v169_v25 = vadd.f32 %v2556_v13, %v2860_v6  ;;  %v3038_v26 = vsel %vm1029_vm1, %v685_v10, -inf  ;;  %v1494_v12 = vld [vmem:[%s3927_s3 + $0x2f8] sm:$0xff] }
 0x10f   :  { %v663_v31 = vrot.slane %v662_v15, 1  ;;  %v344_v49 = vcombine.high %v336_v17, %v336_v17  ;;  %v721_v2 = vsel %vm580_vm0, %v336_v17, -inf  ;;  %v3042_v28 = vsel %vm1029_vm1, %v692_v11, -inf  ;;  %2405 = vmatprep.subr.mxu1 %v1494_v12 }
 0x110   :  { %v1042_v27 = vsel %vm1029_vm1, %v643_v14, -inf  ;;  %v345_v29 = vcombine.high %v343_v24, %v343_v24  ;;  %v312_v30 = vcombine.high %v216_v21, %v216_v21  ;;  %v657_v33 = vmax.f32 %v655_v5, %v656_v20 }
 0x111   :  { %v722_v34 = vrot.slane %v721_v2, 4  ;;  %v728_v35 = vsel %vm580_vm0, %v344_v49, -inf  ;;  %v735_v37 = vsel %vm580_vm0, %v343_v24, -inf  ;;  %v1045_v39 = vsel %vm1029_vm1, %v650_v23, -inf }
 0x112   :  { %v729_v40 = vrot.slane %v728_v35, 4  ;;  %v736_v41 = vrot.slane %v735_v37, 4  ;;  %v219_v44 = vmax.f32 %v169_v25, 0.0  ;;  %v664_v46 = vmax.f32 %v662_v15, %v663_v31 }
 0x113   :  { %v723_v47 = vmax.f32 %v721_v2, %v722_v34  ;;  %v742_v50 = vsel %vm580_vm0, %v345_v29, -inf  ;;  %v319_v43 = vrot.slane %v216_v21, %v2863_v9  ;;  %v326_v54 = vrot.slane %v312_v30, %v2863_v9 }
 0x114   :  { %v730_v51 = vmax.f32 %v728_v35, %v729_v40  ;;  %v737_v52 = vmax.f32 %v735_v37, %v736_v41  ;;  %v743_v53 = vrot.slane %v742_v50, 4  ;;  %v3055_v55 = vsel %vm1029_vm1, %v657_v33, -inf }
 0x115   :  { %v724_v56 = vrot.slane %v723_v47, 2  ;;  %v327_v57 = vcombine.high %v319_v43, %v319_v43  ;;  %v693_v58 = vsel %vm580_vm0, %v319_v43, -inf  ;;  %v328_v0 = vcombine.high %v326_v54, %v326_v54 }
 0x116   :  { %v731_v59 = vrot.slane %v730_v51, 2  ;;  %v738_v61 = vrot.slane %v737_v52, 2  ;;  %v744_v62 = vmax.f32 %v742_v50, %v743_v53  ;;  %v694_v3 = vrot.slane %v693_v58, 4 }
 0x117   :  { %v725_v1 = vmax.f32 %v723_v47, %v724_v56  ;;  %v700_v4 = vsel %vm580_vm0, %v327_v57, -inf  ;;  %v707_v5 = vsel %vm580_vm0, %v326_v54, -inf  ;;  %v1044_v7 = vmax.f32 %v1042_v27, %v3030_v19  ;;  %v163_v57 = vpop.f32.mrf.mxu0 }
 0x118   :  { %v732_v8 = vmax.f32 %v730_v51, %v731_v59  ;;  %v745_v10 = vrot.slane %v744_v62, 2  ;;  %v701_v11 = vrot.slane %v700_v4, 4  ;;  %v739_v32 = vmax.f32 %v737_v52, %v738_v61 }
 0x119   :  { %v695_v13 = vmax.f32 %v693_v58, %v694_v3  ;;  %v708_v14 = vrot.slane %v707_v5, 4  ;;  %v714_v15 = vsel %vm580_vm0, %v328_v0, -inf  ;;  %v1047_v16 = vmax.f32 %v1045_v39, %v3033_v22 }
 0x11a   :  { %v726_v20 = vrot.slane %v725_v1, 1  ;;  %v702_v19 = vmax.f32 %v700_v4, %v701_v11  ;;  %v3069_v21 = vsel %vm1029_vm1, %v664_v46, -inf  ;;  %v715_v25 = vrot.slane %v714_v15, 4 }
 0x11b   :  { %v696_v23 = vrot.slane %v695_v13, 2  ;;  %v709_v24 = vmax.f32 %v707_v5, %v708_v14  ;;  %v733_v31 = vrot.slane %v732_v8, 1  ;;  %v746_v49 = vmax.f32 %v744_v62, %v745_v10 }
 0x11c   :  { %v703_v2 = vrot.slane %v702_v19, 2  ;;  %v363_v27 = vcombine.high %v219_v44, %v219_v44  ;;  %v740_v29 = vrot.slane %v739_v32, 1  ;;  %v716_v34 = vmax.f32 %v714_v15, %v715_v25 }
 0x11d   :  { %v697_v30 = vmax.f32 %v695_v13, %v696_v23  ;;  %v710_v33 = vrot.slane %v709_v24, 2  ;;  %v3074_v35 = vsel %vm1158_vm2, %v1047_v16, %v1044_v7  ;;  %v727_v37 = vmax.f32 %v725_v1, %v726_v20  ;;  %v2559_v20 = vpop.f32.mrf.mxu0 }
 0x11e   :  { %v704_v38 = vmax.f32 %v702_v19, %v703_v2  ;;  %v717_v41 = vrot.slane %v716_v34, 2  ;;  %v370_v46 = vrot.slane %v219_v44, %v2863_v9  ;;  %v734_v47 = vmax.f32 %v732_v8, %v733_v31 }
 0x11f   :  { %v698_v39 = vrot.slane %v697_v30, 1  ;;  %v711_v40 = vmax.f32 %v709_v24, %v710_v33  ;;  %v747_v50 = vrot.slane %v746_v49, 1  ;;  %v377_v51 = vrot.slane %v363_v27, %v2863_v9 }
 0x120   :  { %v705_v43 = vrot.slane %v704_v38, 1  ;;  %v741_v52 = vmax.f32 %v739_v32, %v740_v29  ;;  %v718_v54 = vmax.f32 %v716_v34, %v717_v41  ;;  %v378_v56 = vcombine.high %v370_v46, %v370_v46 }
 0x121   :  { %v712_v53 = vrot.slane %v711_v40, 1  ;;  %v379_v59 = vcombine.high %v377_v51, %v377_v51  ;;  %v777_v61 = vsel %vm580_vm0, %v370_v46, -inf  ;;  %v791_v62 = vsel %vm580_vm0, %v377_v51, -inf }
 0x122   :  { %v706_v58 = vmax.f32 %v704_v38, %v705_v43  ;;  %v1055_v0 = vsel %vm1029_vm1, %v727_v37, -inf  ;;  %v699_v1 = vmax.f32 %v697_v30, %v698_v39  ;;  %v719_v44 = vrot.slane %v718_v54, 1 }
 0x123   :  { %v778_v3 = vrot.slane %v777_v61, 4  ;;  %v748_v4 = vmax.f32 %v746_v49, %v747_v50  ;;  %v784_v5 = vsel %vm580_vm0, %v378_v56, -inf  ;;  %v792_v7 = vrot.slane %v791_v62, 4 }
 0x124   :  { %v164_v8 = vadd.f32 %v2860_v6, %v163_v57  ;;  %v1058_v10 = vsel %vm1029_vm1, %v734_v47, -inf  ;;  %v713_v11 = vmax.f32 %v711_v40, %v712_v53  ;;  %v1057_v12 = vsel %vm1029_vm1, %v706_v58, -inf }
 0x125   :  { %v779_v32 = vmax.f32 %v777_v61, %v778_v3  ;;  %v3086_v13 = vsel %vm1029_vm1, %v741_v52, -inf  ;;  %v785_v14 = vrot.slane %v784_v5, 4  ;;  %v793_v15 = vmax.f32 %v791_v62, %v792_v7 }
 0x126   :  { %v798_v16 = vsel %vm580_vm0, %v379_v59, -inf  ;;  %v720_v19 = vmax.f32 %v718_v54, %v719_v44  ;;  %v1054_v23 = vsel %vm1029_vm1, %v699_v1, -inf  ;;  %v1059_v31 = vmax.f32 %v1057_v12, %v1058_v10  ;;  %v173_v59 = vpop.f32.mrf.mxu0 }
 0x127   :  { %v780_v24 = vrot.slane %v779_v32, 2  ;;  %v799_v25 = vrot.slane %v798_v16, 4  ;;  %v786_v49 = vmax.f32 %v784_v5, %v785_v14  ;;  %v794_v2 = vrot.slane %v793_v15, 2 }
 0x128   :  { %v218_v27 = vmax.f32 %v164_v8, 0.0  ;;  %v3091_v29 = vsel %vm1029_vm1, %v713_v11, -inf  ;;  %v179_v34 = vadd.f32 %v2559_v20, %v2860_v6  ;;  %v1056_v41 = vmax.f32 %v1054_v23, %v1055_v0 }
 0x129   :  { %v781_v30 = vmax.f32 %v779_v32, %v780_v24  ;;  %v800_v33 = vmax.f32 %v798_v16, %v799_v25  ;;  %v787_v37 = vrot.slane %v786_v49, 2  ;;  %v795_v38 = vmax.f32 %v793_v15, %v794_v2 }
 0x12a   :  { %v346_v39 = vcombine.high %v218_v27, %v218_v27  ;;  %v353_v40 = vrot.slane %v218_v27, %v2863_v9  ;;  %v3096_v46 = vsel %vm1029_vm1, %v720_v19, -inf  ;;  %v221_v50 = vmax.f32 %v179_v34, 0.0 }
 0x12b   :  { %v801_v47 = vrot.slane %v800_v33, 2  ;;  %v3099_v43 = vsel %vm1029_vm1, %v748_v4, -inf  ;;  %v782_v51 = vrot.slane %v781_v30, 1  ;;  %v3105_v56 = vsel %vm1158_vm2, %v1059_v31, %v1056_v41 }
 0x12c   :  { %v360_v52 = vrot.slane %v346_v39, %v2863_v9  ;;  %v361_v53 = vcombine.high %v353_v40, %v353_v40  ;;  %v788_v57 = vmax.f32 %v786_v49, %v787_v37  ;;  %v749_v58 = vsel %vm580_vm0, %v353_v40, -inf }
 0x12d   :  { %v796_v62 = vrot.slane %v795_v38, 1  ;;  %v750_v1 = vrot.slane %v749_v58, 4  ;;  %v802_v44 = vmax.f32 %v800_v33, %v801_v47  ;;  %v397_v5 = vcombine.high %v221_v50, %v221_v50 }
 0x12e   :  { %v362_v0 = vcombine.high %v360_v52, %v360_v52  ;;  %v756_v3 = vsel %vm580_vm0, %v361_v53, -inf  ;;  %v763_v4 = vsel %vm580_vm0, %v360_v52, -inf  ;;  %v783_v7 = vmax.f32 %v781_v30, %v782_v51 }
 0x12f   :  { %v751_v8 = vmax.f32 %v749_v58, %v750_v1  ;;  %v757_v10 = vrot.slane %v756_v3, 4  ;;  %v174_v11 = vadd.f32 %v2860_v6, %v173_v59  ;;  %v789_v12 = vrot.slane %v788_v57, 1 }
 0x130   :  { %v764_v32 = vrot.slane %v763_v4, 4  ;;  %v770_v14 = vsel %vm580_vm0, %v362_v0, -inf  ;;  %v404_v15 = vrot.slane %v221_v50, %v2863_v9  ;;  %v797_v16 = vmax.f32 %v795_v38, %v796_v62 }
 0x131   :  { %v752_v20 = vrot.slane %v751_v8, 2  ;;  %v758_v19 = vmax.f32 %v756_v3, %v757_v10  ;;  %v771_v23 = vrot.slane %v770_v14, 4  ;;  %v803_v24 = vrot.slane %v802_v44, 1 }
 0x132   :  { %v765_v25 = vmax.f32 %v763_v4, %v764_v32  ;;  %v411_v31 = vrot.slane %v397_v5, %v2863_v9  ;;  %v412_v49 = vcombine.high %v404_v15, %v404_v15  ;;  %v833_v33 = vsel %vm580_vm0, %v404_v15, -inf }
 0x133   :  { %v753_v2 = vmax.f32 %v751_v8, %v752_v20  ;;  %v759_v27 = vrot.slane %v758_v19, 2  ;;  %v772_v30 = vmax.f32 %v770_v14, %v771_v23  ;;  %v834_v39 = vrot.slane %v833_v33, 4 }
 0x134   :  { %v766_v34 = vrot.slane %v765_v25, 2  ;;  %v413_v37 = vcombine.high %v411_v31, %v411_v31  ;;  %v840_v40 = vsel %vm580_vm0, %v412_v49, -inf  ;;  %v847_v53 = vsel %vm580_vm0, %v411_v31, -inf }
 0x135   :  { %v754_v41 = vrot.slane %v753_v2, 1  ;;  %v760_v38 = vmax.f32 %v758_v19, %v759_v27  ;;  %v773_v47 = vrot.slane %v772_v30, 2  ;;  %v841_v50 = vrot.slane %v840_v40, 4 }
 0x136   :  { %v767_v51 = vmax.f32 %v765_v25, %v766_v34  ;;  %v835_v52 = vmax.f32 %v833_v33, %v834_v39  ;;  %v854_v58 = vsel %vm580_vm0, %v413_v37, -inf  ;;  %v848_v5 = vrot.slane %v847_v53, 4 }
 0x137   :  { %v755_v59 = vmax.f32 %v753_v2, %v754_v41  ;;  %v761_v62 = vrot.slane %v760_v38, 1  ;;  %v774_v0 = vmax.f32 %v772_v30, %v773_v47  ;;  %v842_v1 = vmax.f32 %v840_v40, %v841_v50  ;;  %v2562_v30 = vpop.f32.mrf.mxu0 }
 0x138   :  { %v768_v3 = vrot.slane %v767_v51, 1  ;;  %v836_v4 = vrot.slane %v835_v52, 2  ;;  %v855_v8 = vrot.slane %v854_v58, 4  ;;  %v790_v10 = vmax.f32 %v788_v57, %v789_v12 }
 0x139   :  { %v762_v32 = vmax.f32 %v760_v38, %v761_v62  ;;  %v775_v14 = vrot.slane %v774_v0, 1  ;;  %v843_v15 = vrot.slane %v842_v1, 2  ;;  %v804_v20 = vmax.f32 %v802_v44, %v803_v24 }
 0x13a   :  { %v769_v19 = vmax.f32 %v767_v51, %v768_v3  ;;  %v837_v23 = vmax.f32 %v835_v52, %v836_v4  ;;  %v849_v25 = vmax.f32 %v847_v53, %v848_v5  ;;  %v3121_v31 = vsel %vm1029_vm1, %v783_v7, -inf  ;;  %v183_v51 = vpop.f32.mrf.mxu0 }
 0x13b   :  { %v776_v49 = vmax.f32 %v774_v0, %v775_v14  ;;  %v856_v2 = vmax.f32 %v854_v58, %v855_v8  ;;  %v220_v27 = vmax.f32 %v174_v11, 0.0  ;;  %v3124_v33 = vsel %vm1029_vm1, %v797_v16, -inf }
 0x13c   :  { %v3127_v34 = vsel %vm1029_vm1, %v755_v59, -inf  ;;  %v844_v57 = vmax.f32 %v842_v1, %v843_v15  ;;  %v850_v12 = vrot.slane %v849_v25, 2  ;;  %v3130_v44 = vsel %vm1029_vm1, %v790_v10, -inf }
 0x13d   :  { %v3133_v24 = vsel %vm1029_vm1, %v762_v32, -inf  ;;  %v3136_v7 = vsel %vm1029_vm1, %v769_v19, -inf  ;;  %v857_v37 = vrot.slane %v856_v2, 2  ;;  %v3139_v11 = vsel %vm1029_vm1, %v804_v20, -inf }
 0x13e   :  { %v3142_v16 = vsel %vm1029_vm1, %v776_v49, -inf  ;;  %v838_v39 = vrot.slane %v837_v23, 1  ;;  %v851_v40 = vmax.f32 %v849_v25, %v850_v12  ;;  %v1068_v41 = vmax.f32 %v3127_v34, %v3121_v31 }
 0x13f   :  { %v858_v38 = vmax.f32 %v856_v2, %v857_v37  ;;  %v380_v47 = vcombine.high %v220_v27, %v220_v27  ;;  %v387_v50 = vrot.slane %v220_v27, %v2863_v9  ;;  %v1071_v52 = vmax.f32 %v3133_v24, %v3130_v44 }
 0x140   :  { %v845_v58 = vrot.slane %v844_v57, 1  ;;  %v189_v59 = vadd.f32 %v2562_v30, %v2860_v6  ;;  %v852_v0 = vrot.slane %v851_v40, 1  ;;  %v839_v4 = vmax.f32 %v837_v23, %v838_v39 }
 0x141   :  { %v394_v1 = vrot.slane %v380_v47, %v2863_v9  ;;  %v395_v3 = vcombine.high %v387_v50, %v387_v50  ;;  %v805_v5 = vsel %vm580_vm0, %v387_v50, -inf  ;;  %v184_v10 = vadd.f32 %v2860_v6, %v183_v51 }
 0x142   :  { %v223_v8 = vmax.f32 %v189_v59, 0.0  ;;  %v859_v32 = vrot.slane %v858_v38, 1  ;;  %v806_v15 = vrot.slane %v805_v5, 4  ;;  %v846_v19 = vmax.f32 %v844_v57, %v845_v58 }
 0x143   :  { %v396_v14 = vcombine.high %v394_v1, %v394_v1  ;;  %v812_v20 = vsel %vm580_vm0, %v395_v3, -inf  ;;  %v819_v49 = vsel %vm580_vm0, %v394_v1, -inf  ;;  %v853_v27 = vmax.f32 %v851_v40, %v852_v0 }
 0x144   :  { %v813_v25 = vrot.slane %v812_v20, 4  ;;  %v431_v2 = vcombine.high %v223_v8, %v223_v8  ;;  %v807_v30 = vmax.f32 %v805_v5, %v806_v15  ;;  %v820_v12 = vrot.slane %v819_v49, 4 }
 0x145   :  { %v826_v23 = vsel %vm580_vm0, %v396_v14, -inf  ;;  %v438_v47 = vrot.slane %v223_v8, %v2863_v9  ;;  %v860_v50 = vmax.f32 %v858_v38, %v859_v32  ;;  %v222_v3 = vmax.f32 %v184_v10, 0.0 }
 0x146   :  { %v814_v37 = vmax.f32 %v812_v20, %v813_v25  ;;  %v827_v39 = vrot.slane %v826_v23, 4  ;;  %v445_v6 = vrot.slane %v431_v2, %v2863_v9  ;;  %v808_v51 = vrot.slane %v807_v30, 2 }
 0x147   :  { %v821_v59 = vmax.f32 %v819_v49, %v820_v12  ;;  %v446_v62 = vcombine.high %v438_v47, %v438_v47  ;;  %v889_v0 = vsel %vm580_vm0, %v438_v47, -inf  ;;  %v414_v17 = vcombine.high %v222_v3, %v222_v3 }
 0x148   :  { %v815_v57 = vrot.slane %v814_v37, 2  ;;  %v828_v58 = vmax.f32 %v826_v23, %v827_v39  ;;  %v447_v1 = vcombine.high %v445_v6, %v445_v6  ;;  %v809_v53 = vmax.f32 %v807_v30, %v808_v51 }
 0x149   :  { %v822_v40 = vrot.slane %v821_v59, 2  ;;  %v903_v5 = vsel %vm580_vm0, %v445_v6, -inf  ;;  %v890_v20 = vrot.slane %v889_v0, 4  ;;  %v896_v8 = vsel %vm580_vm0, %v446_v62, -inf }
 0x14a   :  { %v816_v14 = vmax.f32 %v814_v37, %v815_v57  ;;  %v829_v15 = vrot.slane %v828_v58, 2  ;;  %v810_v25 = vrot.slane %v809_v53, 1  ;;  %v897_v32 = vrot.slane %v896_v8, 4 }
 0x14b   :  { %v823_v38 = vmax.f32 %v821_v59, %v822_v40  ;;  %v904_v49 = vrot.slane %v903_v5, 4  ;;  %v891_v12 = vmax.f32 %v889_v0, %v890_v20  ;;  %v910_v23 = vsel %vm580_vm0, %v447_v1, -inf }
 0x14c   :  { %v817_v10 = vrot.slane %v816_v14, 1  ;;  %v830_v2 = vmax.f32 %v828_v58, %v829_v15  ;;  %v811_v30 = vmax.f32 %v809_v53, %v810_v25  ;;  %v898_v51 = vmax.f32 %v896_v8, %v897_v32  ;;  %v2565_v8 = vpop.f32.mrf.mxu0 }
 0x14d   :  { %v824_v39 = vrot.slane %v823_v38, 1  ;;  %v905_v47 = vmax.f32 %v903_v5, %v904_v49  ;;  %v892_v37 = vrot.slane %v891_v12, 2  ;;  %v911_v57 = vrot.slane %v910_v23, 4 }
 0x14e   :  { %v818_v61 = vmax.f32 %v816_v14, %v817_v10  ;;  %v831_v6 = vrot.slane %v830_v2, 1  ;;  %v899_v22 = vrot.slane %v898_v51, 2  ;;  %v1078_v40 = vsel %vm1029_vm1, %v811_v30, -inf }
 0x14f   :  { %v825_v54 = vmax.f32 %v823_v38, %v824_v39  ;;  %v906_v62 = vrot.slane %v905_v47, 2  ;;  %v421_v0 = vrot.slane %v222_v3, %v2863_v9  ;;  %v3176_v53 = vsel %vm1158_vm2, %v1071_v52, %v1068_v41 }
 0x150   :  { %v832_v59 = vmax.f32 %v830_v2, %v831_v6  ;;  %v1081_v58 = vsel %vm1029_vm1, %v818_v61, -inf  ;;  %v1079_v1 = vsel %vm1029_vm1, %v839_v4, -inf  ;;  %v893_v5 = vmax.f32 %v891_v12, %v892_v37 }
 0x151   :  { %v900_v14 = vmax.f32 %v898_v51, %v899_v22  ;;  %v1082_v15 = vsel %vm1029_vm1, %v846_v19, -inf  ;;  %v3181_v20 = vsel %vm1029_vm1, %v853_v27, -inf  ;;  %v907_v61 = vmax.f32 %v905_v47, %v906_v62 }
 0x152   :  { %v912_v3 = vmax.f32 %v910_v23, %v911_v57  ;;  %v3184_v31 = vsel %vm1029_vm1, %v860_v50, -inf  ;;  %v1080_v34 = vmax.f32 %v1078_v40, %v1079_v1  ;;  %v1083_v44 = vmax.f32 %v1081_v58, %v1082_v15  ;;  %v3197_v50 = vld [vmem:[%s3928_s2] ss:$0 sm:$0xff] }
 0x153   :  { %3934 = vst [vmem:[#allocation3_spill] sm:$0xff] %v3184_v31  ;;  %v3187_v24 = vsel %vm1029_vm1, %v825_v54, -inf  ;;  %v3190_v41 = vsel %vm1029_vm1, %v832_v59, -inf  ;;  %v428_v52 = vrot.slane %v414_v17, %v2863_v9  ;;  %v429_v4 = vcombine.high %v421_v0, %v421_v0  ;;  %v193_v59 = vpop.f32.mrf.mxu0 }
 0x154   :  { %v913_v22 = vrot.slane %v912_v3, 2  ;;  %v894_v19 = vrot.slane %v893_v5, 1  ;;  %v901_v27 = vrot.slane %v900_v14, 1  ;;  %v861_v25 = vsel %vm580_vm0, %v421_v0, -inf }
 0x155   :  { %v199_v38 = vadd.f32 %v3197_v50, %v2565_v8  ;;  %v908_v32 = vrot.slane %v907_v61, 1  ;;  %v430_v49 = vcombine.high %v428_v52, %v428_v52  ;;  %v862_v10 = vrot.slane %v861_v25, 4 }
 0x156   :  { %v914_v2 = vmax.f32 %v912_v3, %v913_v22  ;;  %v868_v12 = vsel %vm580_vm0, %v429_v4, -inf  ;;  %v875_v23 = vsel %vm580_vm0, %v428_v52, -inf  ;;  %v3207_v30 = vsel %vm1158_vm2, %v1083_v44, %v1080_v34 }
 0x157   :  { %v863_v39 = vmax.f32 %v861_v25, %v862_v10  ;;  %v869_v51 = vrot.slane %v868_v12, 4  ;;  %v876_v47 = vrot.slane %v875_v23, 4  ;;  %v895_v6 = vmax.f32 %v893_v5, %v894_v19 }
 0x158   :  { %v902_v37 = vmax.f32 %v900_v14, %v901_v27  ;;  %v882_v57 = vsel %vm580_vm0, %v430_v49, -inf  ;;  %v225_v62 = vmax.f32 %v199_v38, 0.0  ;;  %v909_v40 = vmax.f32 %v907_v61, %v908_v32 }
 0x159   :  { %v864_v58 = vrot.slane %v863_v39, 2  ;;  %v870_v0 = vmax.f32 %v868_v12, %v869_v51  ;;  %v877_v1 = vmax.f32 %v875_v23, %v876_v47  ;;  %v915_v15 = vrot.slane %v914_v2, 1 }
 0x15a   :  { %v883_v3 = vrot.slane %v882_v57, 4  ;;  %v465_v8 = vcombine.high %v225_v62, %v225_v62  ;;  %v472_v22 = vrot.slane %v225_v62, %v2863_v9  ;;  %v194_v4 = vadd.f32 %v3197_v50, %v193_v59 }
 0x15b   :  { %v865_v34 = vmax.f32 %v863_v39, %v864_v58  ;;  %v871_v44 = vrot.slane %v870_v0, 2  ;;  %v878_v52 = vrot.slane %v877_v1, 2  ;;  %v916_v54 = vmax.f32 %v914_v2, %v915_v15 }
 0x15c   :  { %v884_v5 = vmax.f32 %v882_v57, %v883_v3  ;;  %v479_v14 = vrot.slane %v465_v8, %v2863_v9  ;;  %v480_v19 = vcombine.high %v472_v22, %v472_v22  ;;  %v945_v27 = vsel %vm580_vm0, %v472_v22, -inf }
 0x15d   :  { %v866_v61 = vrot.slane %v865_v34, 1  ;;  %v872_v25 = vmax.f32 %v870_v0, %v871_v44  ;;  %v879_v38 = vmax.f32 %v877_v1, %v878_v52  ;;  %v946_v32 = vrot.slane %v945_v27, 4 }
 0x15e   :  { %v885_v49 = vrot.slane %v884_v5, 2  ;;  %v481_v10 = vcombine.high %v479_v14, %v479_v14  ;;  %v952_v12 = vsel %vm580_vm0, %v480_v19, -inf  ;;  %v959_v23 = vsel %vm580_vm0, %v479_v14, -inf }
 0x15f   :  { %v867_v39 = vmax.f32 %v865_v34, %v866_v61  ;;  %v873_v51 = vrot.slane %v872_v25, 1  ;;  %v880_v47 = vrot.slane %v879_v38, 1  ;;  %v947_v62 = vmax.f32 %v945_v27, %v946_v32  ;;  %v2568_v27 = vpop.f32.mrf.mxu0 }
 0x160   :  { %v886_v57 = vmax.f32 %v884_v5, %v885_v49  ;;  %v953_v59 = vrot.slane %v952_v12, 4  ;;  %v960_v58 = vrot.slane %v959_v23, 4  ;;  %v966_v3 = vsel %vm580_vm0, %v481_v10, -inf }
 0x161   :  { %v1091_v8 = vsel %vm1029_vm1, %v895_v6, -inf  ;;  %v874_v0 = vmax.f32 %v872_v25, %v873_v51  ;;  %v948_v1 = vrot.slane %v947_v62, 2  ;;  %v224_v22 = vmax.f32 %v194_v4, 0.0  ;;  %v203_v63 = vpop.f32.mrf.mxu0 }
 0x162   :  { %v881_v44 = vmax.f32 %v879_v38, %v880_v47  ;;  %v887_v52 = vrot.slane %v886_v57, 1  ;;  %v954_v17 = vmax.f32 %v952_v12, %v953_v59  ;;  %v961_v19 = vmax.f32 %v959_v23, %v960_v58 }
 0x163   :  { %v1094_v34 = vsel %vm1029_vm1, %v902_v37, -inf  ;;  %v3220_v14 = vsel %vm1029_vm1, %v909_v40, -inf  ;;  %v967_v5 = vrot.slane %v966_v3, 4  ;;  %v1090_v61 = vsel %vm1029_vm1, %v867_v39, -inf }
 0x164   :  { %v1093_v32 = vsel %vm1029_vm1, %v874_v0, -inf  ;;  %v955_v6 = vrot.slane %v954_v17, 2  ;;  %v209_v25 = vadd.f32 %v3197_v50, %v2568_v27  ;;  %v949_v4 = vmax.f32 %v947_v62, %v948_v1 }
 0x165   :  { %v962_v38 = vrot.slane %v961_v19, 2  ;;  %v968_v49 = vmax.f32 %v966_v3, %v967_v5  ;;  %v448_v10 = vcombine.high %v224_v22, %v224_v22  ;;  %v888_v12 = vmax.f32 %v886_v57, %v887_v52 }
 0x166   :  { %v3226_v2 = vsel %vm1029_vm1, %v881_v44, -inf  ;;  %v956_v37 = vmax.f32 %v954_v17, %v955_v6  ;;  %v455_v40 = vrot.slane %v224_v22, %v2863_v9  ;;  %v3230_v15 = vsel %vm1029_vm1, %v916_v54, -inf }
 0x167   :  { %v1092_v23 = vmax.f32 %v1090_v61, %v1091_v8  ;;  %v963_v39 = vmax.f32 %v961_v19, %v962_v38  ;;  %v969_v51 = vrot.slane %v968_v49, 2  ;;  %v1095_v47 = vmax.f32 %v1093_v32, %v1094_v34 }
 0x168   :  { %v462_v59 = vrot.slane %v448_v10, %v2863_v9  ;;  %v463_v62 = vcombine.high %v455_v40, %v455_v40  ;;  %v917_v58 = vsel %vm580_vm0, %v455_v40, -inf  ;;  %v950_v3 = vrot.slane %v949_v4, 1 }
 0x169   :  { %v957_v0 = vrot.slane %v956_v37, 1  ;;  %v918_v17 = vrot.slane %v917_v58, 4  ;;  %v3237_v1 = vsel %vm1029_vm1, %v888_v12, -inf  ;;  %v964_v44 = vrot.slane %v963_v39, 1 }
 0x16a   :  { %v464_v54 = vcombine.high %v462_v59, %v462_v59  ;;  %v924_v8 = vsel %vm580_vm0, %v463_v62, -inf  ;;  %v931_v22 = vsel %vm580_vm0, %v462_v59, -inf  ;;  %v970_v52 = vmax.f32 %v968_v49, %v969_v51 }
 0x16b   :  { %v919_v19 = vmax.f32 %v917_v58, %v918_v17  ;;  %v925_v34 = vrot.slane %v924_v8, 4  ;;  %v3242_v5 = vsel %vm1158_vm2, %v1095_v47, %v1092_v23  ;;  %v932_v27 = vrot.slane %v931_v22, 4 }
 0x16c   :  { %v938_v61 = vsel %vm580_vm0, %v464_v54, -inf  ;;  %v227_v32 = vmax.f32 %v209_v25, 0.0  ;;  %v951_v6 = vmax.f32 %v949_v4, %v950_v3  ;;  %v958_v38 = vmax.f32 %v956_v37, %v957_v0 }
 0x16d   :  { %v920_v10 = vrot.slane %v919_v19, 2  ;;  %v926_v12 = vmax.f32 %v924_v8, %v925_v34  ;;  %v933_v40 = vmax.f32 %v931_v22, %v932_v27  ;;  %v939_v57 = vrot.slane %v938_v61, 4 }
 0x16e   :  { %v499_v62 = vcombine.high %v227_v32, %v227_v32  ;;  %v506_v59 = vrot.slane %v227_v32, %v2863_v9  ;;  %v965_v49 = vmax.f32 %v963_v39, %v964_v44  ;;  %v971_v51 = vrot.slane %v970_v52, 1 }
 0x16f   :  { %v921_v58 = vmax.f32 %v919_v19, %v920_v10  ;;  %v927_v17 = vrot.slane %v926_v12, 2  ;;  %v934_v23 = vrot.slane %v933_v40, 2  ;;  %v940_v47 = vmax.f32 %v938_v61, %v939_v57 }
 0x170   :  { %v513_v48 = vrot.slane %v499_v62, %v2863_v9  ;;  %v514_v54 = vcombine.high %v506_v59, %v506_v59  ;;  %v1001_v37 = vsel %vm580_vm0, %v506_v59, -inf  ;;  %v204_v3 = vadd.f32 %v3197_v50, %v203_v63 }
 0x171   :  { %v922_v25 = vrot.slane %v921_v58, 1  ;;  %v928_v4 = vmax.f32 %v926_v12, %v927_v17  ;;  %v935_v0 = vmax.f32 %v933_v40, %v934_v23  ;;  %v941_v8 = vrot.slane %v940_v47, 2 }
 0x172   :  { %v515_v22 = vcombine.high %v513_v48, %v513_v48  ;;  %v1002_v34 = vrot.slane %v1001_v37, 4  ;;  %v1008_v44 = vsel %vm580_vm0, %v514_v54, -inf  ;;  %v1015_v19 = vsel %vm580_vm0, %v513_v48, -inf }
 0x173   :  { %v923_v27 = vmax.f32 %v921_v58, %v922_v25  ;;  %v929_v39 = vrot.slane %v928_v4, 1  ;;  %v936_v57 = vrot.slane %v935_v0, 1  ;;  %v942_v61 = vmax.f32 %v940_v47, %v941_v8 }
 0x174   :  { %v1003_v32 = vmax.f32 %v1001_v37, %v1002_v34  ;;  %v1009_v10 = vrot.slane %v1008_v44, 4  ;;  %v1101_v12 = vmax.f32 %v3237_v1, %v3230_v15  ;;  %v972_v62 = vmax.f32 %v970_v52, %v971_v51 }
 0x175   :  { %v1016_v59 = vrot.slane %v1015_v19, 4  ;;  %v1022_v63 = vsel %vm580_vm0, %v515_v22, -inf  ;;  %v930_v50 = vmax.f32 %v928_v4, %v929_v39  ;;  %v943_v40 = vrot.slane %v942_v61, 1 }
 0x176   :  { %v1004_v17 = vrot.slane %v1003_v32, 2  ;;  %v226_v58 = vmax.f32 %v204_v3, 0.0  ;;  %v937_v23 = vmax.f32 %v935_v0, %v936_v57  ;;  %v1010_v25 = vmax.f32 %v1008_v44, %v1009_v10 }
 0x177   :  { %v1017_v54 = vmax.f32 %v1015_v19, %v1016_v59  ;;  %v1023_v31 = vrot.slane %v1022_v63, 4  ;;  %v3255_v48 = vsel %vm1029_vm1, %v951_v6, -inf  ;;  %v3258_v47 = vsel %vm1029_vm1, %v958_v38, -inf }
 0x178   :  { %v3261_v37 = vsel %vm1029_vm1, %v965_v49, -inf  ;;  %v3264_v52 = vsel %vm1029_vm1, %v923_v27, -inf  ;;  %v1005_v51 = vmax.f32 %v1003_v32, %v1004_v17  ;;  %v1011_v4 = vrot.slane %v1010_v25, 2 }
 0x179   :  { %v1018_v8 = vrot.slane %v1017_v54, 2  ;;  %v1024_v3 = vmax.f32 %v1022_v63, %v1023_v31  ;;  %v3267_v0 = vsel %vm1029_vm1, %v972_v62, -inf  ;;  %v944_v22 = vmax.f32 %v942_v61, %v943_v40 }
 0x17a   :  { %v3270_v6 = vsel %vm1029_vm1, %v930_v50, -inf  ;;  %v482_v34 = vcombine.high %v226_v58, %v226_v58  ;;  %v3273_v38 = vsel %vm1029_vm1, %v937_v23, -inf  ;;  %v1012_v49 = vmax.f32 %v1010_v25, %v1011_v4 }
 0x17b   :  { %v1019_v39 = vmax.f32 %v1017_v54, %v1018_v8  ;;  %v1025_v44 = vrot.slane %v1024_v3, 2  ;;  %v1104_v27 = vmax.f32 %v3264_v52, %v3255_v48  ;;  %v489_v19 = vrot.slane %v226_v58, %v2863_v9 }
 0x17c   :  { %v496_v31 = vrot.slane %v482_v34, %v2863_v9  ;;  %v1107_v57 = vmax.f32 %v3270_v6, %v3258_v47  ;;  %v1006_v61 = vrot.slane %v1005_v51, 1  ;;  %v1013_v32 = vrot.slane %v1012_v49, 1 }
 0x17d   :  { %v1020_v10 = vrot.slane %v1019_v39, 1  ;;  %v1110_v62 = vmax.f32 %v3273_v38, %v3261_v37  ;;  %v497_v59 = vcombine.high %v489_v19, %v489_v19  ;;  %v973_v50 = vsel %vm580_vm0, %v489_v19, -inf }
 0x17e   :  { %v498_v63 = vcombine.high %v496_v31, %v496_v31  ;;  %v3285_v40 = vsel %vm1029_vm1, %v944_v22, -inf  ;;  %v1026_v17 = vmax.f32 %v1024_v3, %v1025_v44  ;;  %v974_v58 = vrot.slane %v973_v50, 4 }
 0x17f   :  { %v3935_v23 = vmax.f32 %v2960_v60, %v2919_v36  ;;  %v980_v54 = vsel %vm580_vm0, %v497_v59, -inf  ;;  %v987_v48 = vsel %vm580_vm0, %v496_v31, -inf  ;;  %v1007_v52 = vmax.f32 %v1005_v51, %v1006_v61 }
 0x180   :  { %v994_v47 = vsel %vm580_vm0, %v498_v63, -inf  ;;  %v1014_v4 = vmax.f32 %v1012_v49, %v1013_v32  ;;  %v1021_v8 = vmax.f32 %v1019_v39, %v1020_v10  ;;  %v975_v22 = vmax.f32 %v973_v50, %v974_v58 }
 0x181   :  { %v1161_v25 = vsel %vm1160_vm3, %v3935_v23, %v3027_v18  ;;  %v981_v6 = vrot.slane %v980_v54, 4  ;;  %v988_v3 = vrot.slane %v987_v48, 4  ;;  %v995_v34 = vrot.slane %v994_v47, 4 }
 0x182   :  { %v3936_v44 = vmax.f32 %v3013_v45, %v2928_v42  ;;  %v1027_v60 = vrot.slane %v1026_v17, 1  ;;  %v976_v18 = vrot.slane %v975_v22, 2  ;;  %v3937_v19 = vmax.f32 %v3055_v55, %v3038_v26 }
 0x183   :  { %v982_v49 = vmax.f32 %v980_v54, %v981_v6  ;;  %v989_v39 = vmax.f32 %v987_v48, %v988_v3  ;;  %v996_v61 = vmax.f32 %v994_v47, %v995_v34  ;;  %v3938_v32 = vmax.f32 %v3069_v21, %v3042_v28 }
 0x184   :  { %v1163_v36 = vsel %vm1162_vm4, %v3936_v44, %v1161_v25  ;;  %v1165_v31 = vsel %vm1160_vm3, %v3937_v19, %v3074_v35  ;;  %v977_v45 = vmax.f32 %v975_v22, %v976_v18  ;;  %v1028_v21 = vmax.f32 %v1026_v17, %v1027_v60 }
 0x185   :  { %v1193_v51 = vsel %vm1029_vm1, %v1163_v36, 0.0  ;;  %v1166_v42 = vsel %vm1162_vm4, %v3938_v32, %v1165_v31  ;;  %v983_v63 = vrot.slane %v982_v49, 2  ;;  %v990_v50 = vrot.slane %v989_v39, 2 }
 0x186   :  { %v1194_v10 = vsel %vm1029_vm1, %v1166_v42, 0.0  ;;  %v1209_v59 = vrot.slane %v1193_v51, 7  ;;  %v997_v26 = vrot.slane %v996_v61, 2  ;;  %v978_v35 = vrot.slane %v977_v45, 1 }
 0x187   :  { %v1210_v55 = vrot.slane %v1194_v10, 7  ;;  %v984_v23 = vmax.f32 %v982_v49, %v983_v63  ;;  %v991_v25 = vmax.f32 %v989_v39, %v990_v50  ;;  %v2618_v22 = vmov 0.0  }
 0x188   :  { %v1226_v58 = vsel %vm1225_vm5, 0.0, %v1209_v59  ;;  %v998_v54 = vmax.f32 %v996_v61, %v997_v26  ;;  %v1250_v6 = vcombine.high %v2618_v22, %v2618_v22  ;;  %v979_v3 = vmax.f32 %v977_v45, %v978_v35 }
 0x189   :  { %v1227_v28 = vsel %vm1225_vm5, 0.0, %v1210_v55  ;;  %v1235_v48 = vsel %vm1234_vm6, %v1226_v58, 0.0  ;;  %v985_v34 = vrot.slane %v984_v23, 1  ;;  %v992_v44 = vrot.slane %v991_v25, 1 }
 0x18a   :  { %v3314_v47 = vsel %vm1234_vm6, %v1227_v28, 0.0  ;;  %v999_v36 = vrot.slane %v998_v54, 1  ;;  %v1113_v18 = vmax.f32 %v3285_v40, %v3267_v0  ;;  %v3321_v19 = vsel %vm1158_vm2, %v1107_v57, %v1104_v27  ;;  %v1537_v28 = vld [vmem:[%s3927_s3 + $0x450] sm:$0xff] }
 0x18b   :  { %v3324_v17 = vsel %vm1029_vm1, %v1007_v52, -inf  ;;  %v1363_v60 = vcombine.low %v1235_v48, %v3314_v47  ;;  %v3328_v31 = vsel %vm1029_vm1, %v1014_v4, -inf  ;;  %v986_v51 = vmax.f32 %v984_v23, %v985_v34  ;;  %v1538_v4 = vld [vmem:[%s3927_s3 + $0x458] sm:$0xff] }
 0x18c   :  { %v993_v49 = vmax.f32 %v991_v25, %v992_v44  ;;  %v1251_v39 = vcombine.high %v1235_v48, %v1235_v48  ;;  %v2263_v61 = vrot.slane %v2618_v22, 9  ;;  %v1262_v32 = vrot.slane %v1250_v6, 5 }
 0x18d   :  { %1699 = vmatprep.mubr.f32.mxu0 %v1363_v60  ;;  %v3332_v27 = vsel %vm1029_vm1, %v1021_v8, -inf  ;;  %v3335_v57 = vsel %vm1029_vm1, %v1028_v21, -inf  ;;  %v1000_v52 = vmax.f32 %v998_v54, %v999_v36  ;;  %v1114_v42 = vsel %vm1029_vm1, %v979_v3, -inf }
 0x18e   :  { %v1117_v45 = vsel %vm1029_vm1, %v986_v51, -inf  ;;  %v3344_v10 = vsel %vm1029_vm1, %v993_v49, -inf  ;;  %v2271_v59 = vrot.slane %v1235_v48, 10  ;;  %v3348_v8 = vcombine.high %v3314_v47, %v3314_v47 }
 0x18f   :  { %v3352_v63 = vsel %vm3338_vm9, %v2263_v61, %v1262_v32  ;;  %v2264_v50 = vrot.slane %v1235_v48, 9  ;;  %v1266_v26 = vrot.slane %v1251_v39, 5  ;;  %v1293_v55 = vrot.slane %v1250_v6, 6  ;;  %v1477_v61 = vld [vmem:[%s3927_s3 + $0x270] sm:$0xff] }
 0x190   :  { %v1116_v35 = vmax.f32 %v1114_v42, %v3324_v17  ;;  %v1297_v58 = vrot.slane %v1251_v39, 6  ;;  %v1119_v23 = vmax.f32 %v1117_v45, %v3328_v31  ;;  %v3357_v25 = vsel %vm1029_vm1, %v1000_v52, -inf  ;;  %v1478_v31 = vld [vmem:[%s3927_s3 + $0x278] sm:$0xff] }
 0x191   :  { %v3361_v54 = vsel %vm3338_vm9, %v2264_v50, %v1266_v26  ;;  %v2270_v21 = vrot.slane %v2618_v22, 10  ;;  %v1122_v6 = vmax.f32 %v3344_v10, %v3332_v27  ;;  %v3943_v44 = vmax.f32 %v3091_v29, %v3086_v13  ;;  %v1510_v39 = vld [vmem:[%s3927_s3 + $0x378] sm:$0xff]  ;;  %v1509_v50 = vld [vmem:[%s3927_s3 + $0x370] sm:$0xff]  ;;  %v1488_v10 = vld [vmem:[%s3927_s3 + $0x2c8] sm:$0xff] }
 0x192   :  { %v1347_v3 = vcombine.low %v3352_v63, %v3361_v54  ;;  %v3375_v34 = vsel %vm3364_vm12, %v2271_v59, %v1297_v58  ;;  %v1339_v60 = vcombine.low %v2618_v22, %v1235_v48  ;;  %v3944_v51 = vmax.f32 %v3096_v46, %v3099_v43  ;;  %v1493_v46 = vld [vmem:[%s3927_s3 + $0x2f0] sm:$0xff]  ;;  %v1476_v58 = vld [vmem:[%s3927_s3 + $0x268] sm:$0xff] }
 0x193   :  { %v1168_v36 = vsel %vm1160_vm3, %v3943_v44, %v3105_v56  ;;  %v3384_v17 = vsel %vm3364_vm12, %v2270_v21, %v1293_v55  ;;  %v3945_v13 = vmax.f32 %v3136_v7, %v3124_v33  ;;  %v1125_v56 = vmax.f32 %v3357_v25, %v3335_v57  ;;  %v1524_v55 = vld [vmem:[%s3927_s3 + $0x3e8] sm:$0xff] }
 0x194   :  { %v1169_v49 = vsel %vm1162_vm4, %v3944_v51, %v1168_v36  ;;  %1614 = vmatprep.mubr.f32.mxu1 %v1347_v3  ;;  %v1355_v48 = vcombine.low %v3384_v17, %v3375_v34  ;;  %v3946_v43 = vmax.f32 %v3142_v16, %v3139_v11  ;;  %v3947_v11 = vmax.f32 %v3187_v24, %v3181_v20  ;;  %v1492_v20 = vld [vmem:[%s3927_s3 + $0x2e8] sm:$0xff]  ;;  %v1491_v3 = vld [vmem:[%s3927_s3 + $0x2e0] sm:$0xff] }
 0x195   :  { %v1171_v29 = vsel %vm1160_vm3, %v3945_v13, %v3176_v53  ;;  %v1195_v7 = vsel %vm1029_vm1, %v1169_v49, 0.0  ;;  %1615 = vmatmul.mubr.f32.vlgmr.msra.gmra.mxu1 %v1339_v60  ;;  %v1525_v53 = vld [vmem:[%s3927_s3 + $0x3f0] sm:$0xff]  ;;  %v3948_v42 = vmax.f32 %v3226_v2, %v3220_v14  ;;  %v2265_v59 = vrot.slane %v3314_v47, 9  ;;  %v1507_v13 = vld [vmem:[%s3927_s3 + $0x360] sm:$0xff] }
 0x196   :  { %v1172_v33 = vsel %vm1162_vm4, %v3946_v43, %v1171_v29  ;;  %v1211_v52 = vrot.slane %v1195_v7, 7  ;;  %v1174_v16 = vsel %vm1160_vm3, %v3947_v11, %v3207_v30  ;;  %1700 = vmatmul.mubr.f32.vlgmr.msra.gmra.mxu0 %v1355_v48  ;;  %2406 = vmatpush3.msra.mxu1 %v1478_v31  ;;  %v3949_v30 = vld [vmem:[#allocation3_spill] sm:$0xff]  ;;  %v1182_v1 = vsel %vm1158_vm2, %v1119_v23, %v1116_v35  ;;  %v1506_v11 = vld [vmem:[%s3927_s3 + $0x358] sm:$0xff] }
 0x197   :  { %v1196_v32 = vsel %vm1029_vm1, %v1172_v33, 0.0  ;;  %v1177_v45 = vsel %vm1160_vm3, %v3948_v42, %v3242_v5  ;;  %v3950_v26 = vmax.f32 %v3190_v41, %v3949_v30  ;;  %v1270_v5 = vrot.slane %v3348_v8, 5  ;;  %2450 = vmatpush3.msra.mxu0 %v1510_v39  ;;  %2407 = vmatprep.subr.mxu1 %v1493_v46  ;;  %v1523_v35 = vld [vmem:[%s3927_s3 + $0x3e0] sm:$0xff] }
 0x198   :  { %v1212_v24 = vrot.slane %v1196_v32, 7  ;;  %v1178_v2 = vsel %vm1162_vm4, %v1101_v12, %v1177_v45  ;;  %v1228_v41 = vsel %vm1225_vm5, 0.0, %v1211_v52  ;;  %2451 = vmatprep.subr.mxu0 %v1525_v53  ;;  %2408 = vmatpush3.msra.mxu1 %v1477_v61  ;;  %v1508_v12 = vld [vmem:[%s3927_s3 + $0x368] sm:$0xff]  ;;  %v1301_v51 = vrot.slane %v3348_v8, 6  ;;  %v1475_v48 = vld [vmem:[%s3927_s3 + $0x260] sm:$0xff]  ;;  %v1522_v8 = vld [vmem:[%s3927_s3 + $0x3d8] sm:$0xff] }
 0x199   :  { %v1175_v14 = vsel %vm1162_vm4, %v3950_v26, %v1174_v16  ;;  %v1198_v15 = vsel %vm1029_vm1, %v1178_v2, 0.0  ;;  %v1237_v36 = vsel %vm1234_vm6, %v1228_v41, 0.0  ;;  %2452 = vmatpush3.msra.mxu0 %v1509_v50  ;;  %2409 = vmatprep.subr.mxu1 %v1492_v20  ;;  %v2272_v46 = vrot.slane %v3314_v47, 10  ;;  %v1490_v61 = vld [vmem:[%s3927_s3 + $0x2d8] sm:$0xff]  ;;  %v1505_v2 = vld [vmem:[%s3927_s3 + $0x350] sm:$0xff]  ;;  %v1520_v41 = vld [vmem:[%s3927_s3 + $0x3c8] sm:$0xff] }
 0x19a   :  { %v1197_v21 = vsel %vm1029_vm1, %v1175_v14, 0.0  ;;  %v1229_v44 = vsel %vm1225_vm5, 0.0, %v1212_v24  ;;  %v1253_v31 = vcombine.high %v1237_v36, %v1237_v36  ;;  %v1214_v49 = vrot.slane %v1198_v15, 7  ;;  %2453 = vmatprep.subr.mxu0 %v1524_v55  ;;  %2410 = vmatpush3.msra.mxu1 %v1476_v58  ;;  %v1474_v16 = vld [vmem:[%s3927_s3 + $0x258] sm:$0xff]  ;;  %v1489_v14 = vld [vmem:[%s3927_s3 + $0x2d0] sm:$0xff]  ;;  %v1519_v15 = vld [vmem:[%s3927_s3 + $0x3c0] sm:$0xff] }
 0x19b   :  { %v1213_v60 = vrot.slane %v1197_v21, 7  ;;  %v3469_v23 = vsel %vm1234_vm6, %v1229_v44, 0.0  ;;  %v2266_v39 = vrot.slane %v1237_v36, 9  ;;  %2454 = vmatpush3.msra.mxu0 %v1508_v12  ;;  %2411 = vmatprep.subr.mxu1 %v1491_v3  ;;  %v2273_v7 = vrot.slane %v1237_v36, 10  ;;  %v1473_v58 = vld [vmem:[%s3927_s3 + $0x250] sm:$0xff]  ;;  %v1487_v12 = vld [vmem:[%s3927_s3 + $0x2c0] sm:$0xff] }
 0x19c   :  { %v1364_v29 = vcombine.low %v1237_v36, %v3469_v23  ;;  %v1274_v33 = vrot.slane %v1253_v31, 5  ;;  %v1305_v53 = vrot.slane %v1253_v31, 6  ;;  %v3492_v52 = vsel %vm3338_vm9, %v2265_v59, %v1270_v5  ;;  %2455 = vmatprep.subr.mxu0 %v1523_v35  ;;  %2412 = vmatpush3.msra.mxu1 %v1475_v48  ;;  %v1503_v3 = vld [vmem:[%s3927_s3 + $0x340] sm:$0xff] }
 0x19d   :  { %v1230_v43 = vsel %vm1225_vm5, 0.0, %v1213_v60  ;;  %v1180_v45 = vsel %vm1160_vm3, %v1110_v62, %v3321_v19  ;;  %2456 = vmatpush3.msra.mxu0 %v1507_v13  ;;  %v3513_v50 = vsel %vm3364_vm12, %v2272_v46, %v1301_v51  ;;  %v1231_v24 = vsel %vm1225_vm5, 0.0, %v1214_v49  ;;  %2413 = vmatprep.subr.mxu1 %v1490_v61  ;;  %v1521_v62 = vld [vmem:[%s3927_s3 + $0x3d0] sm:$0xff]  ;;  %v1471_v35 = vld [vmem:[%s3927_s3 + $0x240] sm:$0xff]  ;;  %v1518_v49 = vld [vmem:[%s3927_s3 + $0x3b8] sm:$0xff] }
 0x19e   :  { %v3488_v32 = vsel %vm1234_vm6, %v1230_v43, 0.0  ;;  %1704 = vmatprep.mubr.f32.mxu0 %v1364_v29  ;;  %v3509_v59 = vsel %vm3338_vm9, %v2266_v39, %v1274_v33  ;;  %v3517_v20 = vsel %vm3364_vm12, %v2273_v7, %v1305_v53  ;;  %2457 = vmatprep.subr.mxu0 %v1522_v8  ;;  %v3532_v26 = vcombine.low %v3314_v47, %v1237_v36  ;;  %v1486_v39 = vld [vmem:[%s3927_s3 + $0x2b8] sm:$0xff]  ;;  %v1517_v53 = vld [vmem:[%s3927_s3 + $0x3b0] sm:$0xff] }
 0x19f   :  { %v1254_v42 = vcombine.high %v3488_v32, %v3488_v32  ;;  %v3522_v37 = vcombine.low %v3492_v52, %v3509_v59  ;;  %v3526_v38 = vcombine.low %v3513_v50, %v3517_v20  ;;  %2458 = vmatpush3.msra.mxu0 %v1506_v11  ;;  %2414 = vmatpush3.msra.mxu1 %v1474_v16  ;;  %v2267_v5 = vrot.slane %v3488_v32, 9  ;;  %v1502_v46 = vld [vmem:[%s3927_s3 + $0x338] sm:$0xff]  ;;  %v1485_v11 = vld [vmem:[%s3927_s3 + $0x2b0] sm:$0xff] }
 0x1a0   :  { %v1181_v55 = vsel %vm1162_vm4, %v1113_v18, %v1180_v45  ;;  %v1183_v47 = vsel %vm1160_vm3, %v1122_v6, %v1182_v1  ;;  %v3558_v0 = vsel %vm1234_vm6, %v1231_v24, 0.0  ;;  %v2274_v40 = vrot.slane %v3488_v32, 10  ;;  %2459 = vmatprep.subr.mxu0 %v1521_v62  ;;  %v1504_v6 = vld [vmem:[%s3927_s3 + $0x348] sm:$0xff]  ;;  %2415 = vmatprep.subr.mxu1 %v1489_v14  ;;  %v1470_v7 = vld [vmem:[%s3927_s3 + $0x238] sm:$0xff]  ;;  %v1501_v16 = vld [vmem:[%s3927_s3 + $0x330] sm:$0xff] }
 0x1a1   :  { %v1278_v19 = vrot.slane %v1254_v42, 5  ;;  %v1309_v30 = vrot.slane %v1254_v42, 6  ;;  %1619 = vmatprep.mubr.f32.mxu1 %v3522_v37  ;;  %1705 = vmatmul.mubr.f32.gmra.mxu0 %v3526_v38  ;;  %v1184_v18 = vsel %vm1162_vm4, %v1125_v56, %v1183_v47  ;;  %v1199_v27 = vsel %vm1029_vm1, %v1181_v55, 0.0  ;;  %v1472_v56 = vld [vmem:[%s3927_s3 + $0x248] sm:$0xff]  ;;  %v1469_v45 = vld [vmem:[%s3927_s3 + $0x230] sm:$0xff] }
 0x1a2   :  { %1620 = vmatmul.mubr.f32.gmra.mxu1 %v3532_v26  ;;  %v1200_v57 = vsel %vm1029_vm1, %v1184_v18, 0.0  ;;  %v1215_v25 = vrot.slane %v1199_v27, 7  ;;  %2460 = vmatpush3.msra.mxu0 %v1505_v2  ;;  %v1365_v44 = vcombine.low %v3488_v32, %v3558_v0  ;;  %v1255_v29 = vcombine.high %v3558_v0, %v3558_v0  ;;  %v1516_v24 = vld [vmem:[%s3927_s3 + $0x3a8] sm:$0xff]  ;;  %v1483_v18 = vld [vmem:[%s3927_s3 + $0x2a0] sm:$0xff] }
 0x1a3   :  { %v3575_v21 = vsel %vm3338_vm9, %v2267_v5, %v1278_v19  ;;  %v3586_v1 = vsel %vm3364_vm12, %v2274_v40, %v1309_v30  ;;  %2416 = vmatpush3.msra.mxu1 %v1473_v58  ;;  %2461 = vmatprep.subr.mxu0 %v1520_v41  ;;  %v1216_v36 = vrot.slane %v1200_v57, 7  ;;  %v1341_v33 = vcombine.low %v2618_v22, %v3488_v32  ;;  %v1484_v14 = vld [vmem:[%s3927_s3 + $0x2a8] sm:$0xff]  ;;  %v1515_v58 = vld [vmem:[%s3927_s3 + $0x3a0] sm:$0xff] }
 0x1a4   :  { %v1232_v60 = vsel %vm1225_vm5, 0.0, %v1215_v25  ;;  %2417 = vmatprep.subr.mxu1 %v1488_v10  ;;  %2462 = vmatpush3.msra.mxu0 %v1504_v6  ;;  %v1349_v31 = vcombine.low %v3352_v63, %v3575_v21  ;;  %v1357_v13 = vcombine.low %v3384_v17, %v3586_v1  ;;  %v1282_v32 = vrot.slane %v1255_v29, 5  ;;  %v1500_v2 = vld [vmem:[%s3927_s3 + $0x328] sm:$0xff]  ;;  %v1499_v27 = vld [vmem:[%s3927_s3 + $0x320] sm:$0xff] }
 0x1a5   :  { %v3603_v51 = vsel %vm1234_vm6, %v1232_v60, 0.0  ;;  %2418 = vmatpush3.msra.mxu1 %v1472_v56  ;;  %2463 = vmatprep.subr.mxu0 %v1519_v15  ;;  %v1233_v43 = vsel %vm1225_vm5, 0.0, %v1216_v36  ;;  %v1313_v19 = vrot.slane %v1255_v29, 6  ;;  %v2268_v5 = vrot.slane %v3558_v0, 9  ;;  %v1468_v47 = vld [vmem:[%s3927_s3 + $0x228] sm:$0xff]  ;;  %v1467_v57 = vld [vmem:[%s3927_s3 + $0x220] sm:$0xff] }
 0x1a6   :  { %v1256_v48 = vcombine.high %v3603_v51, %v3603_v51  ;;  %2419 = vmatprep.subr.mxu1 %v1487_v12  ;;  %2464 = vmatpush3.msra.mxu0 %v1503_v3  ;;  %v2269_v42 = vrot.slane %v3603_v51, 9  ;;  %v3643_v62 = vsel %vm1234_vm6, %v1233_v43, 0.0  ;;  %v2276_v30 = vrot.slane %v3603_v51, 10  ;;  %v1514_v15 = vld [vmem:[%s3927_s3 + $0x398] sm:$0xff]  ;;  %v1465_v29 = vld [vmem:[%s3927_s3 + $0x210] sm:$0xff]  ;;  %v1464_v43 = vld [vmem:[%s3927_s3 + $0x208] sm:$0xff] }
 0x1a7   :  { %1709 = vmatprep.mubr.f32.mxu0 %v1365_v44  ;;  %2420 = vmatpush3.msra.mxu1 %v1471_v35  ;;  %v2275_v41 = vrot.slane %v3558_v0, 10  ;;  %v1366_v10 = vcombine.low %v3603_v51, %v3643_v62  ;;  %v3678_v6 = vsel %vm3338_vm9, %v2268_v5, %v1282_v32  ;;  %v1482_v3 = vld [vmem:[%s3927_s3 + $0x298] sm:$0xff]  ;;  %v1321_v44 = vcombine.high %v3469_v23, %v3469_v23 }
 0x1a8   :  { %v1286_v8 = vrot.slane %v1256_v48, 5  ;;  %2465 = vmatprep.subr.mxu0 %v1518_v49  ;;  %1624 = vmatprep.mubr.f32.mxu1 %v1349_v31  ;;  %v1317_v61 = vrot.slane %v1256_v48, 6  ;;  %v1498_v36 = vld [vmem:[%s3927_s3 + $0x318] sm:$0xff]  ;;  %v3709_v60 = vcombine.low %v3558_v0, %v3603_v51  ;;  %v1513_v31 = vld [vmem:[%s3927_s3 + $0x390] sm:$0xff]  ;;  %v1512_v48 = vld [vmem:[%s3927_s3 + $0x388] sm:$0xff]  ;;  %v1371_v32 = vcombine.low %v3361_v54, %v3492_v52 }
 0x1a9   :  { %1710 = vmatmul.mubr.f32.gmra.mxu0 %v1357_v13  ;;  %2421 = vmatprep.subr.mxu1 %v1486_v39  ;;  %v3689_v56 = vsel %vm3364_vm12, %v2275_v41, %v1313_v19  ;;  %v1466_v35 = vld [vmem:[%s3927_s3 + $0x218] sm:$0xff]  ;;  %v1481_v49 = vld [vmem:[%s3927_s3 + $0x290] sm:$0xff]  ;;  %v1325_v51 = vrot.slane %v1321_v44, 5  ;;  %v1379_v13 = vcombine.low %v3375_v34, %v3513_v50  ;;  %v1333_v39 = vrot.slane %v1321_v44, 6  ;;  %v1496_v34 = vld [vmem:[%s3927_s3 + $0x308] sm:$0xff] }
 0x1aa   :  { %2466 = vmatpush3.msra.mxu0 %v1502_v46  ;;  %1625 = vmatmul.mubr.f32.gmra.mxu1 %v1341_v33  ;;  %v3655_v55 = vsel %vm3338_vm9, %v2269_v42, %v1286_v8  ;;  %v3666_v40 = vsel %vm3364_vm12, %v2276_v30, %v1317_v61  ;;  %v1497_v0 = vld [vmem:[%s3927_s3 + $0x310] sm:$0xff]  ;;  %v1480_v46 = vld [vmem:[%s3927_s3 + $0x288] sm:$0xff]  ;;  %v2277_v50 = vrot.slane %v3469_v23, 9  ;;  %v2279_v8 = vrot.slane %v3469_v23, 10  ;;  %v1479_v33 = vld [vmem:[%s3927_s3 + $0x280] sm:$0xff] }
 0x1ab   :  { %2422 = vmatpush3.msra.mxu1 %v1470_v7  ;;  %2467 = vmatprep.subr.mxu0 %v1517_v53  ;;  %v3685_v25 = vcombine.low %v3678_v6, %v3655_v55  ;;  %v3696_v12 = vcombine.low %v3689_v56, %v3666_v40  ;;  %v1495_v7 = vld [vmem:[%s3927_s3 + $0x300] sm:$0xff]  ;;  %v1322_v61 = vcombine.high %v3643_v62, %v3643_v62  ;;  %v2278_v19 = vrot.slane %v3643_v62, 9  ;;  %v1541_v54 = vld [vmem:[%s3927_s3 + $0x470] sm:$0xff] }
 0x1ac   :  { %2423 = vmatprep.subr.mxu1 %v1485_v11  ;;  %2468 = vmatpush3.msra.mxu0 %v1501_v16  ;;  %v1326_v53 = vsel %vm3338_vm9, %v2277_v50, %v1325_v51  ;;  %v1463_v11 = vld [vmem:[%s3927_s3 + $0x200] sm:$0xff]  ;;  %v3763_v16 = vsel %vm3364_vm12, %v2279_v8, %v1333_v39  ;;  %v1387_v52 = vcombine.low %v3469_v23, %v2618_v22  ;;  %vm2256_vm0 = vcmask 1024  }
 0x1ad   :  { %2424 = vmatpush3.msra.mxu1 %v1469_v45  ;;  %2469 = vmatprep.subr.mxu0 %v1516_v24  ;;  %v1391_v42 = vcombine.low %v1326_v53, %v3352_v63  ;;  %v1542_v45 = vld [vmem:[%s3927_s3 + $0x478] sm:$0xff]  ;;  %v1380_v24 = vcombine.low %v3517_v20, %v3763_v16  ;;  %v1329_v30 = vrot.slane %v1322_v61, 5  ;;  %v1540_v20 = vld [vmem:[%s3927_s3 + $0x468] sm:$0xff]  ;;  %v1381_v23 = vcombine.low %v3586_v1, %v3689_v56 }
 0x1ae   :  { %2425 = vmatprep.subr.mxu1 %v1484_v14  ;;  %2470 = vmatpush3.msra.mxu0 %v1500_v2  ;;  %v2280_v14 = vrot.slane %v3643_v62, 10  ;;  %v1372_v2 = vcombine.low %v3509_v59, %v1326_v53  ;;  %v1373_v1 = vcombine.low %v3575_v21, %v3678_v6  ;;  %v1388_v41 = vcombine.low %v3643_v62, %v2618_v22  ;;  %v1534_v22 = vld [vmem:[%s3927_s3 + $0x438] sm:$0xff]  ;;  %v1533_v62 = vld [vmem:[%s3927_s3 + $0x430] sm:$0xff]  ;;  %v1528_v6 = vld [vmem:[%s3927_s3 + $0x408] sm:$0xff] }
 0x1af   :  { %2426 = vmatpush3.msra.mxu1 %v1468_v47  ;;  %2471 = vmatprep.subr.mxu0 %v1515_v58  ;;  %v1330_v5 = vsel %vm3338_vm9, %v2278_v19, %v1329_v30  ;;  %v1539_v47 = vld [vmem:[%s3927_s3 + $0x460] sm:$0xff] }
 0x1b0   :  { %2427 = vmatprep.subr.mxu1 %v1483_v18  ;;  %2472 = vmatpush3.msra.mxu0 %v1499_v27  ;;  %v1392_v58 = vcombine.low %v1330_v5, %v3352_v63  ;;  %v1536_v18 = vld [vmem:[%s3927_s3 + $0x448] sm:$0xff]  ;;  %v1374_v21 = vcombine.low %v3655_v55, %v1330_v5  ;;  %v1530_v27 = vld [vmem:[%s3927_s3 + $0x418] sm:$0xff] }
 0x1b1   :  { %1714 = vmatprep.mubr.f32.mxu0 %v1366_v10  ;;  %2428 = vmatpush3.msra.mxu1 %v1467_v57  ;;  %v1532_v55 = vld [vmem:[%s3927_s3 + $0x428] sm:$0xff]  ;;  %v1529_v10 = vld [vmem:[%s3927_s3 + $0x410] sm:$0xff]  ;;  %v1527_v57 = vld [vmem:[%s3927_s3 + $0x400] sm:$0xff] }
 0x1b2   :  { %2473 = vmatprep.subr.mxu0 %v1514_v15  ;;  %1629 = vmatprep.mubr.f32.mxu1 %v3685_v25 }
 0x1b3   :  { %1715 = vmatmul.mubr.f32.gmra.mxu0 %v3696_v12  ;;  %2429 = vmatprep.subr.mxu1 %v1482_v3 }
 0x1b4   :  { %2474 = vmatpush3.msra.mxu0 %v1498_v36  ;;  %1630 = vmatmul.mubr.f32.gmra.mxu1 %v3709_v60 }
 0x1b5   :  { %2430 = vmatpush3.msra.mxu1 %v1466_v35  ;;  %2475 = vmatprep.subr.mxu0 %v1513_v31 }
 0x1b6   :  { %1869 = vmatprep.mubr.f32.mxu0 %v3522_v37  ;;  %2431 = vmatprep.subr.mxu1 %v1481_v49  ;;  %v1511_v37 = vld [vmem:[%s3927_s3 + $0x380] sm:$0xff] }
 0x1b7   :  { %1784 = vmatprep.mubr.f32.mxu1 %v1379_v13  ;;  %2476 = vmatpush3.msra.mxu0 %v1497_v0 }
 0x1b8   :  { %2432 = vmatpush3.msra.mxu1 %v1465_v29  ;;  %2477 = vmatprep.subr.mxu0 %v1512_v48 }
 0x1b9   :  { %2433 = vmatprep.subr.mxu1 %v1480_v46  ;;  %2478 = vmatpush3.msra.mxu0 %v1496_v34 }
 0x1ba   :  { %2434 = vmatpush3.msra.mxu1 %v1464_v43  ;;  %2479 = vmatprep.subr.mxu0 %v1511_v37 }
 0x1bb   :  { %2435 = vmatprep.subr.mxu1 %v1479_v33  ;;  %2480 = vmatpush3.msra.mxu0 %v1495_v7 }
 0x1bc   :  { %2436 = vmatpush3.msra.mxu1 %v1463_v11  ;;  %1870 = vmatmul.mubr.f32.vlgmr.msra.gmra.mxu0 %v3532_v26  ;;  %v1337_v26 = vrot.slane %v1322_v61, 6 }
 0x1bd   :  { %1785 = vmatmul.mubr.f32.vlgmr.msra.gmra.mxu1 %v1371_v32  ;;  %1874 = vmatprep.mubr.f32.mxu0 %v1391_v42  ;;  %v2281_v32 = vld [vmem:[%s3929_s4] ss:$0 sm:$0xff]  ;;  %s2619_s4 = smov 96  }
 0x1be   :  { %2569 = vmatprep.subr.mxu1 %v1542_v45  ;;  %1789 = vmatprep.mubr.f32.mxu1 %v1380_v24  ;;  %v1338_v59 = vsel %vm3364_vm12, %v2280_v14, %v1337_v26 }
 0x1bf   :  { %2570 = vmatpush3.msra.mxu1 %v1542_v45  ;;  %v1382_v63 = vcombine.low %v3666_v40, %v1338_v59  ;;  %v1535_v40 = vld [vmem:[%s3927_s3 + $0x440] sm:$0xff]  ;;  %v1396_v56 = vcombine.low %v1338_v59, %v3384_v17 }
 0x1c0   :  { %2571 = vmatprep.subr.mxu1 %v1541_v54  ;;  %1875 = vmatmul.mubr.f32.gmra.mxu0 %v1387_v52 }
 0x1c1   :  { %2572 = vmatpush3.msra.mxu1 %v1541_v54  ;;  %1879 = vmatprep.mubr.f32.mxu0 %v3685_v25  ;;  %v1395_v25 = vcombine.low %v3763_v16, %v3384_v17 }
 0x1c2   :  { %1790 = vmatmul.mubr.f32.gmra.mxu1 %v1372_v2  ;;  %2573 = vmatprep.subr.mxu1 %v1540_v20 }
 0x1c3   :  { %1794 = vmatprep.mubr.f32.mxu1 %v1381_v23  ;;  %2574 = vmatpush3.msra.mxu1 %v1540_v20 }
 0x1c4   :  { %2575 = vmatprep.subr.mxu1 %v1539_v47  ;;  %1880 = vmatmul.mubr.f32.gmra.mxu0 %v3709_v60 }
 0x1c5   :  { %2576 = vmatpush3.msra.mxu1 %v1539_v47  ;;  %1884 = vmatprep.mubr.f32.mxu0 %v1392_v58 }
 0x1c6   :  { %1795 = vmatmul.mubr.f32.gmra.mxu1 %v1373_v1  ;;  %2577 = vmatprep.subr.mxu1 %v1538_v4 }
 0x1c7   :  { %1799 = vmatprep.mubr.f32.mxu1 %v1382_v63  ;;  %2578 = vmatpush3.msra.mxu1 %v1538_v4 }
 0x1c8   :  { %2579 = vmatprep.subr.mxu1 %v1537_v28  ;;  %1885 = vmatmul.mubr.f32.gmra.mxu0 %v1388_v41 }
 0x1c9   :  { %2580 = vmatpush3.msra.mxu1 %v1537_v28 }
 0x1ca   :  { %1800 = vmatmul.mubr.f32.gmra.mxu1 %v1374_v21  ;;  %2581 = vmatprep.subr.mxu1 %v1536_v18 }
 0x1cb   :  { %2582 = vmatpush3.msra.mxu1 %v1536_v18  ;;  %2601 = vmatprep.mubr.f32.mxu1 %v3526_v38  ;;  %v1531_v38 = vld [vmem:[%s3927_s3 + $0x420] sm:$0xff] }
 0x1cc   :  { %2583 = vmatprep.subr.mxu1 %v1535_v40 }
 0x1cd   :  { %2584 = vmatpush3.msra.mxu1 %v1535_v40 }
 0x1ce   :  { %2585 = vmatprep.subr.mxu1 %v1534_v22 }
 0x1cf   :  { %2586 = vmatpush3.msra.mxu1 %v1534_v22 }
 0x1d0   :  { %2587 = vmatprep.subr.mxu1 %v1533_v62 }
 0x1d1   :  { %2588 = vmatpush3.msra.mxu1 %v1533_v62 }
 0x1d2   :  { %2589 = vmatprep.subr.mxu1 %v1532_v55 }
 0x1d3   :  { %2590 = vmatpush3.msra.mxu1 %v1532_v55 }
 0x1d4   :  { %2591 = vmatprep.subr.mxu1 %v1531_v38 }
 0x1d5   :  { %2592 = vmatpush3.msra.mxu1 %v1531_v38 }
 0x1d6   :  { %2593 = vmatprep.subr.mxu1 %v1530_v27 }
 0x1d7   :  { %2594 = vmatpush3.msra.mxu1 %v1530_v27 }
 0x1d8   :  { %2595 = vmatprep.subr.mxu1 %v1529_v10 }
 0x1d9   :  { %2596 = vmatpush3.msra.mxu1 %v1529_v10 }
 0x1da   :  { %2597 = vmatprep.subr.mxu1 %v1528_v6 }
 0x1db   :  { %2598 = vmatpush3.msra.mxu1 %v1528_v6 }
 0x1dc   :  { %2599 = vmatprep.subr.mxu1 %v1527_v57 }
 0x1dd   :  { %2600 = vmatpush3.msra.mxu1 %v1527_v57 }
 0x1de   :  { %2602 = vmatmul.mubr.f32.vlgmr.msra.gmra.mxu1 %v1395_v25 }
 0x1df   :  { %2604 = vmatprep.mubr.f32.mxu1 %v3696_v12 }
 0x1e2   :  { %2605 = vmatmul.mubr.f32.gmra.mxu1 %v1396_v56 }
 0x255   :  { %v2349_v15 = vpop.f32.mrf.mxu1 }
 0x256   :  { %v2393_v44 = vpop.f32.mrf.mxu0 }
 0x257   :  { %v2350_v3 = vpop.f32.mrf.mxu1 }
 0x258   :  { %v2394_v60 = vpop.f32.mrf.mxu0  ;;  %v2351_v11 = vadd.f32 %v2350_v3, %v2349_v15 }
 0x259   :  { %v2395_v14 = vadd.f32 %v2394_v60, %v2393_v44 }
 0x25a   :  { %v1617_v24 = vadd.f32 %v2351_v11, %v2281_v32 }
 0x25c   :  { %v1702_v23 = vadd.f32 %v2395_v14, %v1617_v24 }
 0x261   :  { %v2396_v31 = vpop.f32.mrf.mxu0 }
 0x262   :  { %v2352_v36 = vpop.f32.mrf.mxu1 }
 0x263   :  { %v2397_v0 = vpop.f32.mrf.mxu0 }
 0x264   :  { %v2353_v35 = vpop.f32.mrf.mxu1  ;;  %v2398_v19 = vadd.f32 %v2397_v0, %v2396_v31 }
 0x265   :  { %v2354_v53 = vadd.f32 %v2353_v35, %v2352_v36 }
 0x267   :  { %v1622_v42 = vadd.f32 %v2354_v53, %v2281_v32 }
 0x269   :  { %v2399_v13 = vpop.f32.mrf.mxu0  ;;  %v1707_v20 = vadd.f32 %v2398_v19, %v1622_v42 }
 0x26a   :  { %v2355_v49 = vpop.f32.mrf.mxu1 }
 0x26b   :  { %v2400_v48 = vpop.f32.mrf.mxu0 }
 0x26c   :  { %v2356_v51 = vpop.f32.mrf.mxu1  ;;  %v2401_v22 = vadd.f32 %v2400_v48, %v2399_v13 }
 0x26d   :  { %v2357_v5 = vadd.f32 %v2356_v51, %v2355_v49 }
 0x26f   :  { %v1627_v28 = vadd.f32 %v2357_v5, %v2281_v32 }
 0x271   :  { %v1712_v57 = vadd.f32 %v2401_v22, %v1627_v28 }
 0x273   :  { %v2402_v46 = vpop.f32.mrf.mxu0 }
 0x274   :  { %v2358_v29 = vpop.f32.mrf.mxu1 }
 0x275   :  { %v2403_v12 = vpop.f32.mrf.mxu0 }
 0x276   :  { %v2359_v39 = vpop.f32.mrf.mxu1  ;;  %v2404_v41 = vadd.f32 %v2403_v12, %v2402_v46 }
 0x277   :  { %v2360_v52 = vadd.f32 %v2359_v39, %v2358_v29 }
 0x279   :  { %v1632_v59 = vadd.f32 %v2360_v52, %v2281_v32 }
 0x27b   :  { %v1717_v55 = vadd.f32 %v2404_v41, %v1632_v59 }
 0x27c   :  { %v2481_v17 = vpop.f32.mrf.mxu0 }
 0x27d   :  { %v2437_v34 = vpop.f32.mrf.mxu1 }
 0x27e   :  { %v2482_v37 = vpop.f32.mrf.mxu0 }
 0x27f   :  { %v2438_v50 = vpop.f32.mrf.mxu1  ;;  %v2483_v21 = vadd.f32 %v2482_v37, %v2481_v17 }
 0x280   :  { %v2484_v33 = vpop.f32.mrf.mxu0  ;;  %v2439_v26 = vadd.f32 %v2438_v50, %v2437_v34 }
 0x282   :  { %v2440_v43 = vpop.f32.mrf.mxu1  ;;  %v2485_v61 = vpop.f32.mrf.mxu0  ;;  %v1787_v4 = vadd.f32 %v2439_v26, %v1702_v23 }
 0x283   :  { %v2486_v1 = vadd.f32 %v2485_v61, %v2484_v33 }
 0x284   :  { %v2441_v8 = vpop.f32.mrf.mxu1  ;;  %v2487_v45 = vpop.f32.mrf.mxu0  ;;  %v1872_v6 = vadd.f32 %v2483_v21, %v1787_v4 }
 0x285   :  { %v2442_v30 = vadd.f32 %v2441_v8, %v2440_v43 }
 0x286   :  { %v2443_v7 = vpop.f32.mrf.mxu1  ;;  %v2488_v2 = vpop.f32.mrf.mxu0 }
 0x287   :  { %v1792_v47 = vadd.f32 %v2442_v30, %v1707_v20  ;;  %v2489_v0 = vadd.f32 %v2488_v2, %v2487_v45 }
 0x288   :  { %v2444_v16 = vpop.f32.mrf.mxu1  ;;  %v2490_v63 = vpop.f32.mrf.mxu0 }
 0x289   :  { %v1877_v40 = vadd.f32 %v2486_v1, %v1792_v47  ;;  %v2445_v62 = vadd.f32 %v2444_v16, %v2443_v7 }
 0x28a   :  { %v2446_v54 = vpop.f32.mrf.mxu1  ;;  %v2491_v27 = vpop.f32.mrf.mxu0 }
 0x28b   :  { %v1797_v44 = vadd.f32 %v2445_v62, %v1712_v57  ;;  %v2492_v36 = vadd.f32 %v2491_v27, %v2490_v63 }
 0x28c   :  { %v2447_v58 = vpop.f32.mrf.mxu1 }
 0x28d   :  { %v2448_v18 = vadd.f32 %v2447_v58, %v2446_v54  ;;  %v1882_v50 = vadd.f32 %v2489_v0, %v1797_v44 }
 0x28f   :  { %v1802_v25 = vadd.f32 %v2448_v18, %v1717_v55 }
 0x291   :  { %v1887_v51 = vadd.f32 %v2492_v36, %v1802_v25 }
 0x29e   :  { %v2603_v38 = vpop.f32.mrf.mxu1 }
 0x29f   :  { %v1962_v10 = vadd.f32 %v2603_v38, %v1877_v40 }
 0x2a0   :  { %v1956_v56 = vpop.f32.mrf.mxu1 }
 0x2a1   :  { %v1976_v15 = vmax.f32 %v1962_v10, 0.0  ;;  %v1957_v3 = vadd.f32 %v1956_v56, %v1872_v6 }
 0x2a2   :  { %v2606_v49 = vpop.f32.mrf.mxu1 }
 0x2a3   :  { %v2000_v60 = vcombine.high %v1976_v15, %v1976_v15  ;;  %v2007_v35 = vrot.slane %v1976_v15, %v2863_v9  ;;  %v1975_v31 = vmax.f32 %v1957_v3, 0.0  ;;  %v1972_v12 = vadd.f32 %v2606_v49, %v1887_v51 }
 0x2a4   :  { %v1966_v45 = vpop.f32.mrf.mxu1 }
 0x2a5   :  { %v2014_v13 = vrot.slane %v2000_v60, %v2863_v9  ;;  %v2015_v29 = vcombine.high %v2007_v35, %v2007_v35  ;;  %v2096_v48 = vsel %vm2067_vm13, %v2007_v35, -inf  ;;  %v1983_v39 = vcombine.high %v1975_v31, %v1975_v31 }
 0x2a6   :  { %v2097_v46 = vrot.slane %v2096_v48, 4  ;;  %v1990_v34 = vrot.slane %v1975_v31, %v2863_v9  ;;  %v1978_v54 = vmax.f32 %v1972_v12, 0.0  ;;  %v1967_v23 = vadd.f32 %v1966_v45, %v1882_v50 }
 0x2a7   :  { %v2016_v17 = vcombine.high %v2014_v13, %v2014_v13  ;;  %v2103_v43 = vsel %vm2067_vm13, %v2015_v29, -inf  ;;  %v2110_v37 = vsel %vm2067_vm13, %v2014_v13, -inf  ;;  %v1997_v8 = vrot.slane %v1983_v39, %v2863_v9 }
 0x2a8   :  { %v2098_v33 = vmax.f32 %v2096_v48, %v2097_v46  ;;  %v2104_v7 = vrot.slane %v2103_v43, 4  ;;  %v2111_v53 = vrot.slane %v2110_v37, 4  ;;  %v1998_v61 = vcombine.high %v1990_v34, %v1990_v34 }
 0x2a9   :  { %v2117_v11 = vsel %vm2067_vm13, %v2016_v17, -inf  ;;  %v1999_v16 = vcombine.high %v1997_v8, %v1997_v8  ;;  %v2068_v32 = vsel %vm2067_vm13, %v1990_v34, -inf  ;;  %v2082_v42 = vsel %vm2067_vm13, %v1997_v8, -inf }
 0x2aa   :  { %v2099_v24 = vrot.slane %v2098_v33, 2  ;;  %v3857_v19 = vmax.f32 %v2103_v43, %v2104_v7  ;;  %v2112_v30 = vmax.f32 %v2110_v37, %v2111_v53  ;;  %v2118_v52 = vrot.slane %v2117_v11, 4 }
 0x2ab   :  { %v2069_v14 = vrot.slane %v2068_v32, 4  ;;  %v2075_v26 = vsel %vm2067_vm13, %v1998_v61, -inf  ;;  %v2083_v20 = vrot.slane %v2082_v42, 4  ;;  %v2089_v5 = vsel %vm2067_vm13, %v1999_v16, -inf }
 0x2ac   :  { %v3860_v2 = vmax.f32 %v2098_v33, %v2099_v24  ;;  %v2113_v47 = vrot.slane %v2112_v30, 2  ;;  %v2076_v59 = vrot.slane %v2075_v26, 4  ;;  %v2106_v4 = vrot.slane %v3857_v19, 2 }
 0x2ad   :  { %v2070_v58 = vmax.f32 %v2068_v32, %v2069_v14  ;;  %v2034_v1 = vcombine.high %v1978_v54, %v1978_v54  ;;  %v2041_v63 = vrot.slane %v1978_v54, %v2863_v9  ;;  %v2119_v41 = vmax.f32 %v2117_v11, %v2118_v52 }
 0x2ae   :  { %v2101_v28 = vrot.slane %v3860_v2, 1  ;;  %v2084_v18 = vmax.f32 %v2082_v42, %v2083_v20  ;;  %v2090_v21 = vrot.slane %v2089_v5, 4  ;;  %v1977_v55 = vmax.f32 %v1967_v23, 0.0 }
 0x2af   :  { %v2048_v40 = vrot.slane %v2034_v1, %v2863_v9  ;;  %v2049_v22 = vcombine.high %v2041_v63, %v2041_v63  ;;  %v2152_v62 = vsel %vm2067_vm13, %v2041_v63, -inf  ;;  %v3868_v38 = vmax.f32 %v2112_v30, %v2113_v47 }
 0x2b0   :  { %v2071_v27 = vrot.slane %v2070_v58, 2  ;;  %v2077_v10 = vmax.f32 %v2075_v26, %v2076_v59  ;;  %v2153_v6 = vrot.slane %v2152_v62, 4  ;;  %v2017_v15 = vcombine.high %v1977_v55, %v1977_v55 }
 0x2b1   :  { %v2050_v57 = vcombine.high %v2048_v40, %v2048_v40  ;;  %v2159_v25 = vsel %vm2067_vm13, %v2049_v22, -inf  ;;  %v2166_v56 = vsel %vm2067_vm13, %v2048_v40, -inf  ;;  %v2085_v3 = vrot.slane %v2084_v18, 2 }
 0x2b2   :  { %v2091_v44 = vmax.f32 %v2089_v5, %v2090_v21  ;;  %v2154_v36 = vmax.f32 %v2152_v62, %v2153_v6  ;;  %v2160_v60 = vrot.slane %v2159_v25, 4  ;;  %v2167_v35 = vrot.slane %v2166_v56, 4 }
 0x2b3   :  { %v2173_v31 = vsel %vm2067_vm13, %v2050_v57, -inf  ;;  %v2024_v49 = vrot.slane %v1977_v55, %v2863_v9  ;;  %v2031_v0 = vrot.slane %v2017_v15, %v2863_v9  ;;  %v3875_v51 = vmax.f32 %v2070_v58, %v2071_v27 }
 0x2b4   :  { %v2078_v13 = vrot.slane %v2077_v10, 2  ;;  %v2161_v29 = vmax.f32 %v2159_v25, %v2160_v60  ;;  %v2174_v48 = vrot.slane %v2173_v31, 4  ;;  %v2155_v39 = vrot.slane %v2154_v36, 2 }
 0x2b5   :  { %v2032_v46 = vcombine.high %v2024_v49, %v2024_v49  ;;  %v2033_v34 = vcombine.high %v2031_v0, %v2031_v0  ;;  %v2124_v12 = vsel %vm2067_vm13, %v2024_v49, -inf  ;;  %v3878_v50 = vmax.f32 %v2084_v18, %v2085_v3 }
 0x2b6   :  { %v2162_v17 = vrot.slane %v2161_v29, 2  ;;  %v2168_v43 = vmax.f32 %v2166_v56, %v2167_v35  ;;  %v2125_v37 = vrot.slane %v2124_v12, 4  ;;  %v2175_v8 = vmax.f32 %v2173_v31, %v2174_v48 }
 0x2b7   :  { %v2131_v33 = vsel %vm2067_vm13, %v2032_v46, -inf  ;;  %v2138_v9 = vsel %vm2067_vm13, %v2031_v0, -inf  ;;  %v2145_v7 = vsel %vm2067_vm13, %v2033_v34, -inf  ;;  %v2073_v53 = vrot.slane %v3875_v51, 1 }
 0x2b8   :  { %v2126_v61 = vmax.f32 %v2124_v12, %v2125_v37  ;;  %v2132_v11 = vrot.slane %v2131_v33, 4  ;;  %v2139_v16 = vrot.slane %v2138_v9, 4  ;;  %v2156_v32 = vmax.f32 %v2154_v36, %v2155_v39 }
 0x2b9   :  { %v2146_v42 = vrot.slane %v2145_v7, 4  ;;  %v2107_v45 = vmax.f32 %v3857_v19, %v2106_v4  ;;  %v2120_v24 = vrot.slane %v2119_v41, 2  ;;  %v2163_v14 = vmax.f32 %v2161_v29, %v2162_v17 }
 0x2ba   :  { %v2127_v30 = vrot.slane %v2126_v61, 2  ;;  %v2133_v54 = vmax.f32 %v2131_v33, %v2132_v11  ;;  %v2140_v52 = vmax.f32 %v2138_v9, %v2139_v16  ;;  %v2169_v26 = vrot.slane %v2168_v43, 2 }
 0x2bb   :  { %v2108_v20 = vrot.slane %v2107_v45, 1  ;;  %v2121_v5 = vmax.f32 %v2119_v41, %v2120_v24  ;;  %v2176_v23 = vrot.slane %v2175_v8, 2  ;;  %v2164_v1 = vrot.slane %v2163_v14, 1 }
 0x2bc   :  { %v2128_v47 = vmax.f32 %v2126_v61, %v2127_v30  ;;  %v2134_v58 = vrot.slane %v2133_v54, 2  ;;  %v2141_v59 = vrot.slane %v2140_v52, 2  ;;  %v2079_v40 = vmax.f32 %v2077_v10, %v2078_v13 }
 0x2bd   :  { %v2109_v63 = vmax.f32 %v2107_v45, %v2108_v20  ;;  %v2122_v18 = vrot.slane %v2121_v5, 1  ;;  %v2177_v21 = vmax.f32 %v2175_v8, %v2176_v23  ;;  %v2147_v62 = vmax.f32 %v2145_v7, %v2146_v42 }
 0x2be   :  { %v2142_v22 = vmax.f32 %v2140_v52, %v2141_v59  ;;  %v2165_v19 = vmax.f32 %v2163_v14, %v2164_v1  ;;  %v2092_v4 = vrot.slane %v2091_v44, 2  ;;  %v2087_v55 = vrot.slane %v3878_v50, 1 }
 0x2bf   :  { %v2123_v27 = vmax.f32 %v2121_v5, %v2122_v18  ;;  %v2178_v6 = vrot.slane %v2177_v21, 1  ;;  %v2080_v57 = vrot.slane %v2079_v40, 1  ;;  %v2157_v25 = vrot.slane %v2156_v32, 1 }
 0x2c0   :  { %v2170_v41 = vmax.f32 %v2168_v43, %v2169_v26  ;;  %v2129_v56 = vrot.slane %v2128_v47, 1  ;;  %v2093_v15 = vmax.f32 %v2091_v44, %v2092_v4  ;;  %v2190_v36 = vsel %vm2180_vm14, %v2109_v63, -inf }
 0x2c1   :  { %v2179_v3 = vmax.f32 %v2177_v21, %v2178_v6  ;;  %v2191_v60 = vsel %vm2180_vm14, %v2123_v27, -inf  ;;  %v2135_v35 = vmax.f32 %v2133_v54, %v2134_v58  ;;  %v2143_v10 = vrot.slane %v2142_v22, 1 }
 0x2c2   :  { %v2202_v31 = vsel %vm2180_vm14, %v2165_v19, -inf  ;;  %v2094_v49 = vrot.slane %v2093_v15, 1  ;;  %v2148_v0 = vrot.slane %v2147_v62, 2  ;;  %v2192_v13 = vmax.f32 %v2190_v36, %v2191_v60  ;;  %v2282_v19 = vld [vmem:[%s3931_s5] ss:$0 sm:$0xff] }
 0x2c3   :  { %v2203_v29 = vsel %vm2180_vm14, %v2179_v3, -inf  ;;  %v2081_v48 = vmax.f32 %v2079_v40, %v2080_v57  ;;  %v2136_v39 = vrot.slane %v2135_v35, 1  ;;  %v2115_v44 = vrot.slane %v3868_v38, 1 }
 0x2c4   :  { %v2204_v46 = vmax.f32 %v2202_v31, %v2203_v29  ;;  %v2095_v34 = vmax.f32 %v2093_v15, %v2094_v49  ;;  %v2149_v12 = vmax.f32 %v2147_v62, %v2148_v0  ;;  %v2074_v17 = vmax.f32 %v3875_v51, %v2073_v53 }
 0x2c5   :  { %v2137_v43 = vmax.f32 %v2135_v35, %v2136_v39  ;;  %v2171_v37 = vrot.slane %v2170_v41, 1  ;;  %v2130_v8 = vmax.f32 %v2128_v47, %v2129_v56  ;;  %v2184_v61 = vsel %vm2180_vm14, %v2081_v48, -inf }
 0x2c6   :  { %v2223_v33 = vsel %vm1158_vm2, %v2204_v46, %v2192_v13  ;;  %v2150_v9 = vrot.slane %v2149_v12, 1  ;;  %v2185_v7 = vsel %vm2180_vm14, %v2095_v34, -inf  ;;  %v2102_v11 = vmax.f32 %v3860_v2, %v2101_v28 }
 0x2c7   :  { %2224 = vrot.lane.b32.xlu1 %v2223_v33, %s2619_s4  ;;  %v2158_v16 = vmax.f32 %v2156_v32, %v2157_v25  ;;  %v2172_v42 = vmax.f32 %v2170_v41, %v2171_v37  ;;  %v2116_v51 = vmax.f32 %v3868_v38, %v2115_v44  ;;  %v2088_v53 = vmax.f32 %v3878_v50, %v2087_v55 }
 0x2c8   :  { %v2151_v45 = vmax.f32 %v2149_v12, %v2150_v9  ;;  %v2144_v24 = vmax.f32 %v2142_v22, %v2143_v10  ;;  %v2186_v30 = vmax.f32 %v2184_v61, %v2185_v7  ;;  %v2196_v54 = vsel %vm2180_vm14, %v2137_v43, -inf }
 0x2c9   :  { %v2200_v52 = vsel %vm2180_vm14, %v2172_v42, -inf  ;;  %v2181_v14 = vsel %vm2180_vm14, %v2074_v17, -inf  ;;  %v2182_v20 = vsel %vm2180_vm14, %v2088_v53, -inf  ;;  %v2193_v2 = vsel %vm2180_vm14, %v2130_v8, -inf }
 0x2ca   :  { %v2197_v26 = vsel %vm2180_vm14, %v2151_v45, -inf  ;;  %v2194_v28 = vsel %vm2180_vm14, %v2144_v24, -inf  ;;  %v2183_v38 = vmax.f32 %v2181_v14, %v2182_v20  ;;  %v12_v50 = vstv %s3930_s6 }
 0x2cb   :  { %v2198_v32 = vmax.f32 %v2196_v54, %v2197_v26  ;;  %v2195_v5 = vmax.f32 %v2193_v2, %v2194_v28  ;;  %v2188_v23 = vsel %vm2180_vm14, %v2116_v51, -inf  ;;  %v2199_v47 = vsel %vm2180_vm14, %v2158_v16, -inf  ;;  %13 = vst [vmem:[#allocation2] sm:$0x1] %v12_v50 }
 0x2cc   :  { %v2201_v59 = vmax.f32 %v2199_v47, %v2200_v52  ;;  %v2187_v63 = vsel %vm2180_vm14, %v2102_v11, -inf }
 0x2cd   :  { %v2211_v58 = vsel %vm1158_vm2, %v2198_v32, %v2186_v30  ;;  %v2207_v1 = vsel %vm1158_vm2, %v2195_v5, %v2183_v38  ;;  %v2189_v18 = vmax.f32 %v2187_v63, %v2188_v23 }
 0x2ce   :  { %2212 = vrot.lane.b32.xlu0 %v2211_v58, %s2620_s29 }
 0x2cf   :  { %v2217_v21 = vsel %vm1158_vm2, %v2201_v59, %v2189_v18 }
 0x2d2   :  { %2218 = vrot.lane.b32.xlu0 %v2217_v21, %s2621_s30  ;;  %v2283_v25 = vld [vmem:[#allocation2] ss:$0 sm:$0xff] }
 0x339   :  { %v2225_v4 = vpop.permute.xlu1 %2224 }
 0x340   :  { %v2213_v40 = vpop.permute.xlu0 %2212 }
 0x341   :  { %v2227_v22 = vsel %vm2180_vm14, %v2207_v1, %v2213_v40 }
 0x344   :  { %v2219_v62 = vpop.permute.xlu0 %2218 }
 0x345   :  { %v2228_v55 = vsel %vm1029_vm1, %v2227_v22, %v2219_v62 }
 0x346   :  { %v2230_v27 = vsel %vm2229_vm15, %v2228_v55, %v2225_v4 }
 0x347   :  { %v2238_v6 = vmul.f32 %v2282_v19, %v2230_v27 }
 0x349   :  { %v2239_v57 = vsel %vm1288_vm10, %v2238_v6, 0.0 }
 0x34a   :  { %2240 = vadd.xlane.f32.xlu1 %v2239_v57 }
 0x3d3   :  { %v2241_v41 = vpop.xlane.xlu1 %2240 }
 0x3d4   :  { %v2249_v56 = vadd.f32 %v2283_v25, %v2241_v41 }
 0x3d6   :  { %v2284_v15 = vmul.f32 -1.442695, %v2249_v56 }
 0x3d8   :  { %2612 = vpow2.f32 %v2284_v15 }
 0x3e5   :  { %v2613_v3 = vpop.eup %2612 }
 0x3e6   :  { %v2253_v36 = vadd.f32 1.0, %v2613_v3 }
 0x3e8   :  { %2614 = vrcp.f32 %v2253_v36 }
 0x3f5   :  { %v2615_v60 = vpop.eup %2614 }
 0x3f6   :  { %2257 = vst.msk [vmem:[%s3932_s7] sm:$0x3] %vm2256_vm0, %v2615_v60 }

</bundles_post_ra>
